<compile_context>
chip_gen: v7x
topology: tpu7x:2x2x1
jax: 0.10.0
libtpu: 0.0.40
codegen_flags: <defaults>
</compile_context>

<pallas_src>
import functools

import numpy as np
import jax
import jax.numpy as jnp
from jax.experimental import pallas as pl
from jax.experimental.pallas import tpu as pltpu

_SMEM = pltpu.MemorySpace.SMEM


# ----------------------------- parameter setup (numpy glue, trace-time) -----

def _gaussian_1d(window_size, sigma=1.5):
    xs = np.arange(window_size, dtype=np.float64)
    g = np.exp(-((xs - window_size // 2) ** 2) / (2.0 * sigma ** 2))
    return (g / g.sum()).astype(np.float32)


def _conv_matrices(H, W, wsz):
    """AhtBig (5Ho,5H) and Aw (W,Wo) so that
       blockdiag(Aht)x5 @ vstack(x0..x4) @ Aw == vstack(conv2d_valid(xk, g⊗g))."""
    g = _gaussian_1d(wsz)
    Ho, Wo = H - wsz + 1, W - wsz + 1
    aw = np.zeros((W, Wo), np.float32)
    for j in range(Wo):
        aw[j:j + wsz, j] = g
    aht = np.zeros((Ho, H), np.float32)
    for i in range(Ho):
        aht[i, i:i + wsz] = g
    aht_big = np.kron(np.eye(5, dtype=np.float32), aht)      # (5Ho, 5H)
    return jnp.asarray(aht_big), jnp.asarray(aw), Ho, Wo


def _pool_matrices(H, W):
    """Ph2 (2Hh,2H) and Pw (W,Wh) so that Ph2 @ [a;b] @ Pw == [pool2(a); pool2(b)]."""
    Hh, Wh = H // 2, W // 2
    ph = np.zeros((Hh, H), np.float32)
    ph[np.arange(Hh), 2 * np.arange(Hh)] = 0.5
    ph[np.arange(Hh), 2 * np.arange(Hh) + 1] = 0.5
    pw = np.zeros((W, Wh), np.float32)
    pw[2 * np.arange(Wh), np.arange(Wh)] = 0.5
    pw[2 * np.arange(Wh) + 1, np.arange(Wh)] = 0.5
    ph2 = np.kron(np.eye(2, dtype=np.float32), ph)            # (2Hh, 2H)
    return jnp.asarray(ph2), jnp.asarray(pw), Hh, Wh


# ----------------------------- fused per-level Pallas kernel ----------------

def _level_kernel(c_ref, x1_ref, x2_ref, ahtb_ref, aw_ref, *rest,
                  H, Ho, Hh, do_pool):
    if do_pool:
        ph2_ref, pw_ref, sums_ref, p1_ref, p2_ref = rest
    else:
        (sums_ref,) = rest

    a = x1_ref[0].astype(jnp.float32)          # (H, W) plane of img1
    b = x2_ref[0].astype(jnp.float32)          # (H, W) plane of img2
    C1 = c_ref[0]                              # SMEM scalars
    C2 = c_ref[1]

    # Batched separable Gaussian conv: 2 MXU matmuls cover all five maps.
    xr = jnp.concatenate([a, b, a * a, b * b, a * b], axis=0)              # (5H, W)
    y = jnp.dot(ahtb_ref[...], xr, preferred_element_type=jnp.float32)     # (5Ho, W)
    z = jnp.dot(y, aw_ref[...], preferred_element_type=jnp.float32)        # (5Ho, Wo)

    mu1 = z[0 * Ho:1 * Ho]
    mu2 = z[1 * Ho:2 * Ho]
    e11 = z[2 * Ho:3 * Ho]
    e22 = z[3 * Ho:4 * Ho]
    e12 = z[4 * Ho:5 * Ho]

    mu1_sq = mu1 * mu1
    mu2_sq = mu2 * mu2
    mu1_mu2 = mu1 * mu2
    sigma1_sq = e11 - mu1_sq
    sigma2_sq = e22 - mu2_sq
    sigma12 = e12 - mu1_mu2

    v1 = 2.0 * sigma12 + C2
    v2 = sigma1_sq + sigma2_sq + C2
    cs_map = v1 * pl.reciprocal(v2, approx=True)                 # EUP, no divide
    ssim_map = (2.0 * mu1_mu2 + C1) * cs_map * pl.reciprocal(
        mu1_sq + mu2_sq + C1, approx=True)

    ssim_sum = jnp.sum(ssim_map)
    cs_sum = jnp.sum(cs_map)
    # Lane-dense (2, 128) store of the two per-plane partial sums.
    sums_ref[0] = jnp.concatenate(
        [jnp.full((1, 128), ssim_sum, jnp.float32),
         jnp.full((1, 128), cs_sum, jnp.float32)], axis=0)

    if do_pool:
        # Fused 2x2 average pool (next-level images), both planes in one pair
        # of matmuls via the block-diagonal Ph2.
        stacked = xr[:2 * H]                                     # [a; b]  (2H, W)
        pooled = jnp.dot(
            jnp.dot(ph2_ref[...], stacked, preferred_element_type=jnp.float32),
            pw_ref[...], preferred_element_type=jnp.float32)     # (2Hh, Wh)
        p1_ref[0] = pooled[:Hh]
        p2_ref[0] = pooled[Hh:]


# ----------------------------- wrappers --------------------------------------

def _ssim_level(c1c2, x1, x2, window_size, do_pool):
    """One pyramid level: returns (ssim_mean, cs_mean, pooled1, pooled2)."""
    NC, H, W = x1.shape
    rsz = min(window_size, H, W)
    ahtb, aw, Ho, Wo = _conv_matrices(H, W, rsz)

    in_specs = [
        pl.BlockSpec(memory_space=_SMEM),                    # (C1, C2) scalars
        pl.BlockSpec((1, H, W), lambda i: (i, 0, 0)),        # img1 plane
        pl.BlockSpec((1, H, W), lambda i: (i, 0, 0)),        # img2 plane
        pl.BlockSpec((5 * Ho, 5 * H), lambda i: (0, 0)),     # block-diag Aht
        pl.BlockSpec((W, Wo), lambda i: (0, 0)),             # Aw
    ]
    operands = [c1c2, x1, x2, ahtb, aw]

    sums_shape = jax.ShapeDtypeStruct((NC, 2, 128), jnp.float32)
    sums_spec = pl.BlockSpec((1, 2, 128), lambda i: (i, 0, 0))

    Hh = 0
    if do_pool:
        ph2, pw, Hh, Wh = _pool_matrices(H, W)
        in_specs += [pl.BlockSpec((2 * Hh, 2 * H), lambda i: (0, 0)),
                     pl.BlockSpec((W, Wh), lambda i: (0, 0))]
        operands += [ph2, pw]
        pooled_shape = jax.ShapeDtypeStruct((NC, Hh, Wh), jnp.float32)
        pooled_spec = pl.BlockSpec((1, Hh, Wh), lambda i: (i, 0, 0))
        out_shape = (sums_shape, pooled_shape, pooled_shape)
        out_specs = (sums_spec, pooled_spec, pooled_spec)
    else:
        out_shape = sums_shape
        out_specs = sums_spec

    kernel = functools.partial(_level_kernel, H=H, Ho=Ho, Hh=Hh, do_pool=do_pool)

    result = pl.pallas_call(
        kernel,
        grid=(NC,),
        in_specs=in_specs,
        out_specs=out_specs,
        out_shape=out_shape,
        compiler_params=pltpu.CompilerParams(
            dimension_semantics=("parallel",)),
    )(*operands)

    if do_pool:
        sums, p1, p2 = result
    else:
        sums, p1, p2 = result, None, None

    denom = jnp.float32(NC * Ho * Wo)
    ssim_mean = jnp.sum(sums[:, 0, 0]) / denom    # == ssim_map.mean()
    cs_mean = jnp.sum(sums[:, 1, 0]) / denom      # == mean(v1 / v2)
    return ssim_mean, cs_mean, p1, p2


def msssim(img1, img2, window_size=11, size_average=True):
    assert size_average, "only size_average=True is implemented"
    weights = jnp.asarray([0.0448, 0.2856, 0.3001, 0.2363, 0.1333], jnp.float32)
    levels = int(weights.shape[0])

    N, C, H, W = img1.shape
    x1 = jnp.asarray(img1, jnp.float32).reshape(N * C, H, W)
    x2 = jnp.asarray(img2, jnp.float32).reshape(N * C, H, W)

    mssim, mcs = [], []
    for lvl in range(levels):
        # Data-dependent dynamic range L (same rule as the PyTorch reference),
        # reduced once per level and passed to the kernel as SMEM scalars.
        max_val = jnp.where(jnp.max(x1) > 128.0, 255.0, 1.0)
        min_val = jnp.where(jnp.min(x1) < -0.5, -1.0, 0.0)
        L = (max_val - min_val).astype(jnp.float32)
        c1c2 = jnp.stack([(0.01 * L) ** 2, (0.03 * L) ** 2])

        do_pool = lvl < levels - 1          # last level's pool is unused anyway
        sim, cs, p1, p2 = _ssim_level(c1c2, x1, x2, window_size, do_pool)
        mssim.append(sim)
        mcs.append(cs)
        if do_pool:
            x1, x2 = p1, p2

    mssim = jnp.stack(mssim)
    mcs = jnp.stack(mcs)
    pow1 = mcs ** weights
    pow2 = mssim ** weights
    return jnp.prod(pow1[:-1] * pow2[-1])


class MSSSIM:
    def __init__(self, window_size=11, size_average=True, channel=3):
        self.window_size = window_size
        self.size_average = size_average
        self.channel = channel
        self._fn = jax.jit(functools.partial(
            msssim, window_size=window_size, size_average=size_average))

    def __call__(self, img1, img2):
        return self._fn(img1, img2)


# ----------------------------- demo -----------------------------------------

if __name__ == "__main__":
    key = jax.random.PRNGKey(0)
    k1, k2 = jax.random.split(key)
    # N=2, C=3, 32x32 spatial (32 so that 5 levels of 2x2 pooling are valid,
    # exactly as the PyTorch reference requires).
    img1 = jax.random.uniform(k1, (2, 3, 32, 32), dtype=jnp.float32)
    img2 = jnp.clip(img1 + 0.05 * jax.random.normal(k2, (2, 3, 32, 32),
                                                    dtype=jnp.float32), 0.0, 1.0)

    model = MSSSIM(window_size=11, size_average=True, channel=3)
    out = model(img1, img2)
    jax.block_until_ready(out)
    print("KERNEL_OK")
</pallas_src>

<mosaic_0001>
module attributes {stable_mosaic.version = 11 : i64} {
  func.func @_level_kernel(%arg0: i32, %arg1: memref<2xf32, #tpu.memory_space<smem>>, %arg2: memref<1x32x32xf32, #tpu.memory_space<vmem>>, %arg3: memref<1x32x32xf32, #tpu.memory_space<vmem>>, %arg4: memref<110x160xf32, #tpu.memory_space<vmem>>, %arg5: memref<32x22xf32, #tpu.memory_space<vmem>>, %arg6: memref<32x64xf32, #tpu.memory_space<vmem>>, %arg7: memref<32x16xf32, #tpu.memory_space<vmem>>, %arg8: memref<1x2x128xf32, #tpu.memory_space<vmem>>, %arg9: memref<1x16x16xf32, #tpu.memory_space<vmem>>, %arg10: memref<1x16x16xf32, #tpu.memory_space<vmem>>) attributes {dimension_semantics = [#tpu.dimension_semantics<parallel>], iteration_bounds = array<i64: 6>, scalar_prefetch = 0 : i64, scratch_operands = 0 : i64, tpu.core_type = #tpu.core_type<tc>, window_params = [{transform_indices = @transform_0, window_bounds = array<i64: 2>}, {transform_indices = @transform_1, window_bounds = array<i64: 1, 32, 32>}, {transform_indices = @transform_2, window_bounds = array<i64: 1, 32, 32>}, {pipeline_mode = #tpu.pipeline_mode<synchronous>, transform_indices = @transform_3, window_bounds = array<i64: 110, 160>}, {pipeline_mode = #tpu.pipeline_mode<synchronous>, transform_indices = @transform_4, window_bounds = array<i64: 32, 22>}, {pipeline_mode = #tpu.pipeline_mode<synchronous>, transform_indices = @transform_5, window_bounds = array<i64: 32, 64>}, {pipeline_mode = #tpu.pipeline_mode<synchronous>, transform_indices = @transform_6, window_bounds = array<i64: 32, 16>}, {transform_indices = @transform_7, window_bounds = array<i64: 1, 2, 128>}, {transform_indices = @transform_8, window_bounds = array<i64: 1, 16, 16>}, {transform_indices = @transform_9, window_bounds = array<i64: 1, 16, 16>}]} {
    %c0 = arith.constant 0 : index
    %c0_0 = arith.constant 0 : index
    %c0_1 = arith.constant 0 : index
    %0 = vector.load %arg2[%c0, %c0_0, %c0_1] : memref<1x32x32xf32, #tpu.memory_space<vmem>>, vector<1x32x32xf32>
    %1 = vector.shape_cast %0 : vector<1x32x32xf32> to vector<32x32xf32>
    %c0_2 = arith.constant 0 : index
    %c0_3 = arith.constant 0 : index
    %c0_4 = arith.constant 0 : index
    %2 = vector.load %arg3[%c0_2, %c0_3, %c0_4] : memref<1x32x32xf32, #tpu.memory_space<vmem>>, vector<1x32x32xf32>
    %3 = vector.shape_cast %2 : vector<1x32x32xf32> to vector<32x32xf32>
    %c0_5 = arith.constant 0 : index
    %4 = memref.load %arg1[%c0_5] : memref<2xf32, #tpu.memory_space<smem>>
    %c1 = arith.constant 1 : index
    %5 = memref.load %arg1[%c1] : memref<2xf32, #tpu.memory_space<smem>>
    %6 = arith.mulf %1, %1 : vector<32x32xf32>
    %7 = arith.mulf %3, %3 : vector<32x32xf32>
    %8 = arith.mulf %1, %3 : vector<32x32xf32>
    %9 = tpu.concatenate %1, %3, %6, %7, %8 in 0 : vector<32x32xf32>, vector<32x32xf32>, vector<32x32xf32>, vector<32x32xf32>, vector<32x32xf32> -> vector<160x32xf32>
    %c0_6 = arith.constant 0 : index
    %c0_7 = arith.constant 0 : index
    %10 = vector.load %arg4[%c0_6, %c0_7] : memref<110x160xf32, #tpu.memory_space<vmem>>, vector<110x160xf32>
    %cst = arith.constant dense<0.000000e+00> : vector<110x32xf32>
    %11 = tpu.matmul %10, %9, %cst {dimension_numbers = #tpu.dot_dimension_numbers<[1], [0], [0], [1], [0, 0, 1, 1], [], []>} : vector<110x160xf32>, vector<160x32xf32>, vector<110x32xf32> -> vector<110x32xf32>
    %c0_8 = arith.constant 0 : index
    %c0_9 = arith.constant 0 : index
    %12 = vector.load %arg5[%c0_8, %c0_9] : memref<32x22xf32, #tpu.memory_space<vmem>>, vector<32x22xf32>
    %cst_10 = arith.constant dense<0.000000e+00> : vector<110x22xf32>
    %13 = tpu.matmul %11, %12, %cst_10 {dimension_numbers = #tpu.dot_dimension_numbers<[1], [0], [0], [1], [0, 0, 1, 1], [], []>} : vector<110x32xf32>, vector<32x22xf32>, vector<110x22xf32> -> vector<110x22xf32>
    %14 = vector.extract_strided_slice %13 {offsets = [0, 0], sizes = [22, 22], strides = [1, 1]} : vector<110x22xf32> to vector<22x22xf32>
    %15 = vector.extract_strided_slice %13 {offsets = [22, 0], sizes = [22, 22], strides = [1, 1]} : vector<110x22xf32> to vector<22x22xf32>
    %16 = vector.extract_strided_slice %13 {offsets = [44, 0], sizes = [22, 22], strides = [1, 1]} : vector<110x22xf32> to vector<22x22xf32>
    %17 = vector.extract_strided_slice %13 {offsets = [66, 0], sizes = [22, 22], strides = [1, 1]} : vector<110x22xf32> to vector<22x22xf32>
    %18 = vector.extract_strided_slice %13 {offsets = [88, 0], sizes = [22, 22], strides = [1, 1]} : vector<110x22xf32> to vector<22x22xf32>
    %19 = arith.mulf %14, %14 : vector<22x22xf32>
    %20 = arith.mulf %15, %15 : vector<22x22xf32>
    %21 = arith.mulf %14, %15 : vector<22x22xf32>
    %22 = arith.subf %16, %19 : vector<22x22xf32>
    %23 = arith.subf %17, %20 : vector<22x22xf32>
    %24 = arith.subf %18, %21 : vector<22x22xf32>
    %cst_11 = arith.constant 2.000000e+00 : f32
    %25 = vector.broadcast %cst_11 : f32 to vector<22x22xf32>
    %26 = arith.mulf %25, %24 : vector<22x22xf32>
    %27 = vector.broadcast %5 : f32 to vector<22x22xf32>
    %28 = arith.addf %26, %27 : vector<22x22xf32>
    %29 = arith.addf %22, %23 : vector<22x22xf32>
    %30 = vector.broadcast %5 : f32 to vector<22x22xf32>
    %31 = arith.addf %29, %30 : vector<22x22xf32>
    %32 = tpu.reciprocal %31 {approx = true} : vector<22x22xf32> -> vector<22x22xf32>
    %33 = arith.mulf %28, %32 : vector<22x22xf32>
    %cst_12 = arith.constant 2.000000e+00 : f32
    %34 = vector.broadcast %cst_12 : f32 to vector<22x22xf32>
    %35 = arith.mulf %34, %21 : vector<22x22xf32>
    %36 = vector.broadcast %4 : f32 to vector<22x22xf32>
    %37 = arith.addf %35, %36 : vector<22x22xf32>
    %38 = arith.mulf %37, %33 : vector<22x22xf32>
    %39 = arith.addf %19, %20 : vector<22x22xf32>
    %40 = vector.broadcast %4 : f32 to vector<22x22xf32>
    %41 = arith.addf %39, %40 : vector<22x22xf32>
    %42 = tpu.reciprocal %41 {approx = true} : vector<22x22xf32> -> vector<22x22xf32>
    %43 = arith.mulf %38, %42 : vector<22x22xf32>
    %44 = vector.shape_cast %43 : vector<22x22xf32> to vector<1x22x22xf32>
    %cst_13 = arith.constant dense<0.000000e+00> : vector<1xf32>
    %45 = vector.multi_reduction <add>, %44, %cst_13 [1, 2] : vector<1x22x22xf32> to vector<1xf32>
    %46 = vector.shape_cast %45 : vector<1xf32> to vector<1x1x1xf32>
    %47 = vector.extract %46[0, 0, 0] : f32 from vector<1x1x1xf32>
    %48 = vector.shape_cast %33 : vector<22x22xf32> to vector<1x22x22xf32>
    %cst_14 = arith.constant dense<0.000000e+00> : vector<1xf32>
    %49 = vector.multi_reduction <add>, %48, %cst_14 [1, 2] : vector<1x22x22xf32> to vector<1xf32>
    %50 = vector.shape_cast %49 : vector<1xf32> to vector<1x1x1xf32>
    %51 = vector.extract %50[0, 0, 0] : f32 from vector<1x1x1xf32>
    %52 = vector.broadcast %47 : f32 to vector<1x128xf32>
    %53 = vector.broadcast %51 : f32 to vector<1x128xf32>
    %54 = tpu.concatenate %52, %53 in 0 : vector<1x128xf32>, vector<1x128xf32> -> vector<2x128xf32>
    %c0_15 = arith.constant 0 : index
    %c0_16 = arith.constant 0 : index
    %c0_17 = arith.constant 0 : index
    %55 = vector.load %arg8[%c0_15, %c0_16, %c0_17] : memref<1x2x128xf32, #tpu.memory_space<vmem>>, vector<1x2x128xf32>
    %56 = vector.shape_cast %55 : vector<1x2x128xf32> to vector<2x128xf32>
    %57 = vector.shape_cast %54 : vector<2x128xf32> to vector<1x2x128xf32>
    tpu.vector_store %arg8[%c0_15, %c0_16, %c0_17], %57 {strides = array<i32>} : memref<1x2x128xf32, #tpu.memory_space<vmem>>, vector<1x2x128xf32>,
    %58 = vector.extract_strided_slice %9 {offsets = [0, 0], sizes = [64, 32], strides = [1, 1]} : vector<160x32xf32> to vector<64x32xf32>
    %c0_18 = arith.constant 0 : index
    %c0_19 = arith.constant 0 : index
    %59 = vector.load %arg6[%c0_18, %c0_19] : memref<32x64xf32, #tpu.memory_space<vmem>>, vector<32x64xf32>
    %cst_20 = arith.constant dense<0.000000e+00> : vector<32x32xf32>
    %60 = tpu.matmul %59, %58, %cst_20 {dimension_numbers = #tpu.dot_dimension_numbers<[1], [0], [0], [1], [0, 0, 1, 1], [], []>} : vector<32x64xf32>, vector<64x32xf32>, vector<32x32xf32> -> vector<32x32xf32>
    %c0_21 = arith.constant 0 : index
    %c0_22 = arith.constant 0 : index
    %61 = vector.load %arg7[%c0_21, %c0_22] : memref<32x16xf32, #tpu.memory_space<vmem>>, vector<32x16xf32>
    %cst_23 = arith.constant dense<0.000000e+00> : vector<32x16xf32>
    %62 = tpu.matmul %60, %61, %cst_23 {dimension_numbers = #tpu.dot_dimension_numbers<[1], [0], [0], [1], [0, 0, 1, 1], [], []>} : vector<32x32xf32>, vector<32x16xf32>, vector<32x16xf32> -> vector<32x16xf32>
    %63 = vector.extract_strided_slice %62 {offsets = [0, 0], sizes = [16, 16], strides = [1, 1]} : vector<32x16xf32> to vector<16x16xf32>
    %c0_24 = arith.constant 0 : index
    %c0_25 = arith.constant 0 : index
    %c0_26 = arith.constant 0 : index
    %64 = vector.load %arg9[%c0_24, %c0_25, %c0_26] : memref<1x16x16xf32, #tpu.memory_space<vmem>>, vector<1x16x16xf32>
    %65 = vector.shape_cast %64 : vector<1x16x16xf32> to vector<16x16xf32>
    %66 = vector.shape_cast %63 : vector<16x16xf32> to vector<1x16x16xf32>
    tpu.vector_store %arg9[%c0_24, %c0_25, %c0_26], %66 {strides = array<i32>} : memref<1x16x16xf32, #tpu.memory_space<vmem>>, vector<1x16x16xf32>,
    %67 = vector.extract_strided_slice %62 {offsets = [16, 0], sizes = [16, 16], strides = [1, 1]} : vector<32x16xf32> to vector<16x16xf32>
    %c0_27 = arith.constant 0 : index
    %c0_28 = arith.constant 0 : index
    %c0_29 = arith.constant 0 : index
    %68 = vector.load %arg10[%c0_27, %c0_28, %c0_29] : memref<1x16x16xf32, #tpu.memory_space<vmem>>, vector<1x16x16xf32>
    %69 = vector.shape_cast %68 : vector<1x16x16xf32> to vector<16x16xf32>
    %70 = vector.shape_cast %67 : vector<16x16xf32> to vector<1x16x16xf32>
    tpu.vector_store %arg10[%c0_27, %c0_28, %c0_29], %70 {strides = array<i32>} : memref<1x16x16xf32, #tpu.memory_space<vmem>>, vector<1x16x16xf32>,
    return
  }
  func.func @transform_0(%arg0: i32) -> i32 {
    %c0_i32 = arith.constant 0 : i32
    %c0_i32_0 = arith.constant 0 : i32
    return %c0_i32 : i32
  }
  func.func @transform_1(%arg0: i32) -> (i32, i32, i32) {
    %c0_i32 = arith.constant 0 : i32
    %c0_i32_0 = arith.constant 0 : i32
    %c0_i32_1 = arith.constant 0 : i32
    return %arg0, %c0_i32, %c0_i32_0 : i32, i32, i32
  }
  func.func @transform_2(%arg0: i32) -> (i32, i32, i32) {
    %c0_i32 = arith.constant 0 : i32
    %c0_i32_0 = arith.constant 0 : i32
    %c0_i32_1 = arith.constant 0 : i32
    return %arg0, %c0_i32, %c0_i32_0 : i32, i32, i32
  }
  func.func @transform_3(%arg0: i32) -> (i32, i32) {
    %c0_i32 = arith.constant 0 : i32
    %c0_i32_0 = arith.constant 0 : i32
    %c0_i32_1 = arith.constant 0 : i32
    return %c0_i32, %c0_i32_0 : i32, i32
  }
  func.func @transform_4(%arg0: i32) -> (i32, i32) {
    %c0_i32 = arith.constant 0 : i32
    %c0_i32_0 = arith.constant 0 : i32
    %c0_i32_1 = arith.constant 0 : i32
    return %c0_i32, %c0_i32_0 : i32, i32
  }
  func.func @transform_5(%arg0: i32) -> (i32, i32) {
    %c0_i32 = arith.constant 0 : i32
    %c0_i32_0 = arith.constant 0 : i32
    %c0_i32_1 = arith.constant 0 : i32
    return %c0_i32, %c0_i32_0 : i32, i32
  }
  func.func @transform_6(%arg0: i32) -> (i32, i32) {
    %c0_i32 = arith.constant 0 : i32
    %c0_i32_0 = arith.constant 0 : i32
    %c0_i32_1 = arith.constant 0 : i32
    return %c0_i32, %c0_i32_0 : i32, i32
  }
  func.func @transform_7(%arg0: i32) -> (i32, i32, i32) {
    %c0_i32 = arith.constant 0 : i32
    %c0_i32_0 = arith.constant 0 : i32
    %c0_i32_1 = arith.constant 0 : i32
    return %arg0, %c0_i32, %c0_i32_0 : i32, i32, i32
  }
  func.func @transform_8(%arg0: i32) -> (i32, i32, i32) {
    %c0_i32 = arith.constant 0 : i32
    %c0_i32_0 = arith.constant 0 : i32
    %c0_i32_1 = arith.constant 0 : i32
    return %arg0, %c0_i32, %c0_i32_0 : i32, i32, i32
  }
  func.func @transform_9(%arg0: i32) -> (i32, i32, i32) {
    %c0_i32 = arith.constant 0 : i32
    %c0_i32_0 = arith.constant 0 : i32
    %c0_i32_1 = arith.constant 0 : i32
    return %arg0, %c0_i32, %c0_i32_0 : i32, i32, i32
  }
}

module attributes {stable_mosaic.version = 11 : i64} {
  func.func @_level_kernel(%arg0: i32, %arg1: memref<2xf32, #tpu.memory_space<smem>>, %arg2: memref<1x16x16xf32, #tpu.memory_space<vmem>>, %arg3: memref<1x16x16xf32, #tpu.memory_space<vmem>>, %arg4: memref<30x80xf32, #tpu.memory_space<vmem>>, %arg5: memref<16x6xf32, #tpu.memory_space<vmem>>, %arg6: memref<16x32xf32, #tpu.memory_space<vmem>>, %arg7: memref<16x8xf32, #tpu.memory_space<vmem>>, %arg8: memref<1x2x128xf32, #tpu.memory_space<vmem>>, %arg9: memref<1x8x8xf32, #tpu.memory_space<vmem>>, %arg10: memref<1x8x8xf32, #tpu.memory_space<vmem>>) attributes {dimension_semantics = [#tpu.dimension_semantics<parallel>], iteration_bounds = array<i64: 6>, scalar_prefetch = 0 : i64, scratch_operands = 0 : i64, tpu.core_type = #tpu.core_type<tc>, window_params = [{transform_indices = @transform_0, window_bounds = array<i64: 2>}, {transform_indices = @transform_1, window_bounds = array<i64: 1, 16, 16>}, {transform_indices = @transform_2, window_bounds = array<i64: 1, 16, 16>}, {pipeline_mode = #tpu.pipeline_mode<synchronous>, transform_indices = @transform_3, window_bounds = array<i64: 30, 80>}, {pipeline_mode = #tpu.pipeline_mode<synchronous>, transform_indices = @transform_4, window_bounds = array<i64: 16, 6>}, {pipeline_mode = #tpu.pipeline_mode<synchronous>, transform_indices = @transform_5, window_bounds = array<i64: 16, 32>}, {pipeline_mode = #tpu.pipeline_mode<synchronous>, transform_indices = @transform_6, window_bounds = array<i64: 16, 8>}, {transform_indices = @transform_7, window_bounds = array<i64: 1, 2, 128>}, {transform_indices = @transform_8, window_bounds = array<i64: 1, 8, 8>}, {transform_indices = @transform_9, window_bounds = array<i64: 1, 8, 8>}]} {
    %c0 = arith.constant 0 : index
    %c0_0 = arith.constant 0 : index
    %c0_1 = arith.constant 0 : index
    %0 = vector.load %arg2[%c0, %c0_0, %c0_1] : memref<1x16x16xf32, #tpu.memory_space<vmem>>, vector<1x16x16xf32>
    %1 = vector.shape_cast %0 : vector<1x16x16xf32> to vector<16x16xf32>
    %c0_2 = arith.constant 0 : index
    %c0_3 = arith.constant 0 : index
    %c0_4 = arith.constant 0 : index
    %2 = vector.load %arg3[%c0_2, %c0_3, %c0_4] : memref<1x16x16xf32, #tpu.memory_space<vmem>>, vector<1x16x16xf32>
    %3 = vector.shape_cast %2 : vector<1x16x16xf32> to vector<16x16xf32>
    %c0_5 = arith.constant 0 : index
    %4 = memref.load %arg1[%c0_5] : memref<2xf32, #tpu.memory_space<smem>>
    %c1 = arith.constant 1 : index
    %5 = memref.load %arg1[%c1] : memref<2xf32, #tpu.memory_space<smem>>
    %6 = arith.mulf %1, %1 : vector<16x16xf32>
    %7 = arith.mulf %3, %3 : vector<16x16xf32>
    %8 = arith.mulf %1, %3 : vector<16x16xf32>
    %9 = tpu.concatenate %1, %3, %6, %7, %8 in 0 : vector<16x16xf32>, vector<16x16xf32>, vector<16x16xf32>, vector<16x16xf32>, vector<16x16xf32> -> vector<80x16xf32>
    %c0_6 = arith.constant 0 : index
    %c0_7 = arith.constant 0 : index
    %10 = vector.load %arg4[%c0_6, %c0_7] : memref<30x80xf32, #tpu.memory_space<vmem>>, vector<30x80xf32>
    %cst = arith.constant dense<0.000000e+00> : vector<30x16xf32>
    %11 = tpu.matmul %10, %9, %cst {dimension_numbers = #tpu.dot_dimension_numbers<[1], [0], [0], [1], [0, 0, 1, 1], [], []>} : vector<30x80xf32>, vector<80x16xf32>, vector<30x16xf32> -> vector<30x16xf32>
    %c0_8 = arith.constant 0 : index
    %c0_9 = arith.constant 0 : index
    %12 = vector.load %arg5[%c0_8, %c0_9] : memref<16x6xf32, #tpu.memory_space<vmem>>, vector<16x6xf32>
    %cst_10 = arith.constant dense<0.000000e+00> : vector<30x6xf32>
    %13 = tpu.matmul %11, %12, %cst_10 {dimension_numbers = #tpu.dot_dimension_numbers<[1], [0], [0], [1], [0, 0, 1, 1], [], []>} : vector<30x16xf32>, vector<16x6xf32>, vector<30x6xf32> -> vector<30x6xf32>
    %14 = vector.extract_strided_slice %13 {offsets = [0, 0], sizes = [6, 6], strides = [1, 1]} : vector<30x6xf32> to vector<6x6xf32>
    %15 = vector.extract_strided_slice %13 {offsets = [6, 0], sizes = [6, 6], strides = [1, 1]} : vector<30x6xf32> to vector<6x6xf32>
    %16 = vector.extract_strided_slice %13 {offsets = [12, 0], sizes = [6, 6], strides = [1, 1]} : vector<30x6xf32> to vector<6x6xf32>
    %17 = vector.extract_strided_slice %13 {offsets = [18, 0], sizes = [6, 6], strides = [1, 1]} : vector<30x6xf32> to vector<6x6xf32>
    %18 = vector.extract_strided_slice %13 {offsets = [24, 0], sizes = [6, 6], strides = [1, 1]} : vector<30x6xf32> to vector<6x6xf32>
    %19 = arith.mulf %14, %14 : vector<6x6xf32>
    %20 = arith.mulf %15, %15 : vector<6x6xf32>
    %21 = arith.mulf %14, %15 : vector<6x6xf32>
    %22 = arith.subf %16, %19 : vector<6x6xf32>
    %23 = arith.subf %17, %20 : vector<6x6xf32>
    %24 = arith.subf %18, %21 : vector<6x6xf32>
    %cst_11 = arith.constant 2.000000e+00 : f32
    %25 = vector.broadcast %cst_11 : f32 to vector<6x6xf32>
    %26 = arith.mulf %25, %24 : vector<6x6xf32>
    %27 = vector.broadcast %5 : f32 to vector<6x6xf32>
    %28 = arith.addf %26, %27 : vector<6x6xf32>
    %29 = arith.addf %22, %23 : vector<6x6xf32>
    %30 = vector.broadcast %5 : f32 to vector<6x6xf32>
    %31 = arith.addf %29, %30 : vector<6x6xf32>
    %32 = tpu.reciprocal %31 {approx = true} : vector<6x6xf32> -> vector<6x6xf32>
    %33 = arith.mulf %28, %32 : vector<6x6xf32>
    %cst_12 = arith.constant 2.000000e+00 : f32
    %34 = vector.broadcast %cst_12 : f32 to vector<6x6xf32>
    %35 = arith.mulf %34, %21 : vector<6x6xf32>
    %36 = vector.broadcast %4 : f32 to vector<6x6xf32>
    %37 = arith.addf %35, %36 : vector<6x6xf32>
    %38 = arith.mulf %37, %33 : vector<6x6xf32>
    %39 = arith.addf %19, %20 : vector<6x6xf32>
    %40 = vector.broadcast %4 : f32 to vector<6x6xf32>
    %41 = arith.addf %39, %40 : vector<6x6xf32>
    %42 = tpu.reciprocal %41 {approx = true} : vector<6x6xf32> -> vector<6x6xf32>
    %43 = arith.mulf %38, %42 : vector<6x6xf32>
    %44 = vector.shape_cast %43 : vector<6x6xf32> to vector<1x6x6xf32>
    %cst_13 = arith.constant dense<0.000000e+00> : vector<1xf32>
    %45 = vector.multi_reduction <add>, %44, %cst_13 [1, 2] : vector<1x6x6xf32> to vector<1xf32>
    %46 = vector.shape_cast %45 : vector<1xf32> to vector<1x1x1xf32>
    %47 = vector.extract %46[0, 0, 0] : f32 from vector<1x1x1xf32>
    %48 = vector.shape_cast %33 : vector<6x6xf32> to vector<1x6x6xf32>
    %cst_14 = arith.constant dense<0.000000e+00> : vector<1xf32>
    %49 = vector.multi_reduction <add>, %48, %cst_14 [1, 2] : vector<1x6x6xf32> to vector<1xf32>
    %50 = vector.shape_cast %49 : vector<1xf32> to vector<1x1x1xf32>
    %51 = vector.extract %50[0, 0, 0] : f32 from vector<1x1x1xf32>
    %52 = vector.broadcast %47 : f32 to vector<1x128xf32>
    %53 = vector.broadcast %51 : f32 to vector<1x128xf32>
    %54 = tpu.concatenate %52, %53 in 0 : vector<1x128xf32>, vector<1x128xf32> -> vector<2x128xf32>
    %c0_15 = arith.constant 0 : index
    %c0_16 = arith.constant 0 : index
    %c0_17 = arith.constant 0 : index
    %55 = vector.load %arg8[%c0_15, %c0_16, %c0_17] : memref<1x2x128xf32, #tpu.memory_space<vmem>>, vector<1x2x128xf32>
    %56 = vector.shape_cast %55 : vector<1x2x128xf32> to vector<2x128xf32>
    %57 = vector.shape_cast %54 : vector<2x128xf32> to vector<1x2x128xf32>
    tpu.vector_store %arg8[%c0_15, %c0_16, %c0_17], %57 {strides = array<i32>} : memref<1x2x128xf32, #tpu.memory_space<vmem>>, vector<1x2x128xf32>,
    %58 = vector.extract_strided_slice %9 {offsets = [0, 0], sizes = [32, 16], strides = [1, 1]} : vector<80x16xf32> to vector<32x16xf32>
    %c0_18 = arith.constant 0 : index
    %c0_19 = arith.constant 0 : index
    %59 = vector.load %arg6[%c0_18, %c0_19] : memref<16x32xf32, #tpu.memory_space<vmem>>, vector<16x32xf32>
    %cst_20 = arith.constant dense<0.000000e+00> : vector<16x16xf32>
    %60 = tpu.matmul %59, %58, %cst_20 {dimension_numbers = #tpu.dot_dimension_numbers<[1], [0], [0], [1], [0, 0, 1, 1], [], []>} : vector<16x32xf32>, vector<32x16xf32>, vector<16x16xf32> -> vector<16x16xf32>
    %c0_21 = arith.constant 0 : index
    %c0_22 = arith.constant 0 : index
    %61 = vector.load %arg7[%c0_21, %c0_22] : memref<16x8xf32, #tpu.memory_space<vmem>>, vector<16x8xf32>
    %cst_23 = arith.constant dense<0.000000e+00> : vector<16x8xf32>
    %62 = tpu.matmul %60, %61, %cst_23 {dimension_numbers = #tpu.dot_dimension_numbers<[1], [0], [0], [1], [0, 0, 1, 1], [], []>} : vector<16x16xf32>, vector<16x8xf32>, vector<16x8xf32> -> vector<16x8xf32>
    %63 = vector.extract_strided_slice %62 {offsets = [0, 0], sizes = [8, 8], strides = [1, 1]} : vector<16x8xf32> to vector<8x8xf32>
    %c0_24 = arith.constant 0 : index
    %c0_25 = arith.constant 0 : index
    %c0_26 = arith.constant 0 : index
    %64 = vector.load %arg9[%c0_24, %c0_25, %c0_26] : memref<1x8x8xf32, #tpu.memory_space<vmem>>, vector<1x8x8xf32>
    %65 = vector.shape_cast %64 : vector<1x8x8xf32> to vector<8x8xf32>
    %66 = vector.shape_cast %63 : vector<8x8xf32> to vector<1x8x8xf32>
    tpu.vector_store %arg9[%c0_24, %c0_25, %c0_26], %66 {strides = array<i32>} : memref<1x8x8xf32, #tpu.memory_space<vmem>>, vector<1x8x8xf32>,
    %67 = vector.extract_strided_slice %62 {offsets = [8, 0], sizes = [8, 8], strides = [1, 1]} : vector<16x8xf32> to vector<8x8xf32>
    %c0_27 = arith.constant 0 : index
    %c0_28 = arith.constant 0 : index
    %c0_29 = arith.constant 0 : index
    %68 = vector.load %arg10[%c0_27, %c0_28, %c0_29] : memref<1x8x8xf32, #tpu.memory_space<vmem>>, vector<1x8x8xf32>
    %69 = vector.shape_cast %68 : vector<1x8x8xf32> to vector<8x8xf32>
    %70 = vector.shape_cast %67 : vector<8x8xf32> to vector<1x8x8xf32>
    tpu.vector_store %arg10[%c0_27, %c0_28, %c0_29], %70 {strides = array<i32>} : memref<1x8x8xf32, #tpu.memory_space<vmem>>, vector<1x8x8xf32>,
    return
  }
  func.func @transform_0(%arg0: i32) -> i32 {
    %c0_i32 = arith.constant 0 : i32
    %c0_i32_0 = arith.constant 0 : i32
    return %c0_i32 : i32
  }
  func.func @transform_1(%arg0: i32) -> (i32, i32, i32) {
    %c0_i32 = arith.constant 0 : i32
    %c0_i32_0 = arith.constant 0 : i32
    %c0_i32_1 = arith.constant 0 : i32
    return %arg0, %c0_i32, %c0_i32_0 : i32, i32, i32
  }
  func.func @transform_2(%arg0: i32) -> (i32, i32, i32) {
    %c0_i32 = arith.constant 0 : i32
    %c0_i32_0 = arith.constant 0 : i32
    %c0_i32_1 = arith.constant 0 : i32
    return %arg0, %c0_i32, %c0_i32_0 : i32, i32, i32
  }
  func.func @transform_3(%arg0: i32) -> (i32, i32) {
    %c0_i32 = arith.constant 0 : i32
    %c0_i32_0 = arith.constant 0 : i32
    %c0_i32_1 = arith.constant 0 : i32
    return %c0_i32, %c0_i32_0 : i32, i32
  }
  func.func @transform_4(%arg0: i32) -> (i32, i32) {
    %c0_i32 = arith.constant 0 : i32
    %c0_i32_0 = arith.constant 0 : i32
    %c0_i32_1 = arith.constant 0 : i32
    return %c0_i32, %c0_i32_0 : i32, i32
  }
  func.func @transform_5(%arg0: i32) -> (i32, i32) {
    %c0_i32 = arith.constant 0 : i32
    %c0_i32_0 = arith.constant 0 : i32
    %c0_i32_1 = arith.constant 0 : i32
    return %c0_i32, %c0_i32_0 : i32, i32
  }
  func.func @transform_6(%arg0: i32) -> (i32, i32) {
    %c0_i32 = arith.constant 0 : i32
    %c0_i32_0 = arith.constant 0 : i32
    %c0_i32_1 = arith.constant 0 : i32
    return %c0_i32, %c0_i32_0 : i32, i32
  }
  func.func @transform_7(%arg0: i32) -> (i32, i32, i32) {
    %c0_i32 = arith.constant 0 : i32
    %c0_i32_0 = arith.constant 0 : i32
    %c0_i32_1 = arith.constant 0 : i32
    return %arg0, %c0_i32, %c0_i32_0 : i32, i32, i32
  }
  func.func @transform_8(%arg0: i32) -> (i32, i32, i32) {
    %c0_i32 = arith.constant 0 : i32
    %c0_i32_0 = arith.constant 0 : i32
    %c0_i32_1 = arith.constant 0 : i32
    return %arg0, %c0_i32, %c0_i32_0 : i32, i32, i32
  }
  func.func @transform_9(%arg0: i32) -> (i32, i32, i32) {
    %c0_i32 = arith.constant 0 : i32
    %c0_i32_0 = arith.constant 0 : i32
    %c0_i32_1 = arith.constant 0 : i32
    return %arg0, %c0_i32, %c0_i32_0 : i32, i32, i32
  }
}

module attributes {stable_mosaic.version = 11 : i64} {
  func.func @_level_kernel(%arg0: i32, %arg1: memref<2xf32, #tpu.memory_space<smem>>, %arg2: memref<1x8x8xf32, #tpu.memory_space<vmem>>, %arg3: memref<1x8x8xf32, #tpu.memory_space<vmem>>, %arg4: memref<5x40xf32, #tpu.memory_space<vmem>>, %arg5: memref<8x1xf32, #tpu.memory_space<vmem>>, %arg6: memref<8x16xf32, #tpu.memory_space<vmem>>, %arg7: memref<8x4xf32, #tpu.memory_space<vmem>>, %arg8: memref<1x2x128xf32, #tpu.memory_space<vmem>>, %arg9: memref<1x4x4xf32, #tpu.memory_space<vmem>>, %arg10: memref<1x4x4xf32, #tpu.memory_space<vmem>>) attributes {dimension_semantics = [#tpu.dimension_semantics<parallel>], iteration_bounds = array<i64: 6>, scalar_prefetch = 0 : i64, scratch_operands = 0 : i64, tpu.core_type = #tpu.core_type<tc>, window_params = [{transform_indices = @transform_0, window_bounds = array<i64: 2>}, {transform_indices = @transform_1, window_bounds = array<i64: 1, 8, 8>}, {transform_indices = @transform_2, window_bounds = array<i64: 1, 8, 8>}, {pipeline_mode = #tpu.pipeline_mode<synchronous>, transform_indices = @transform_3, window_bounds = array<i64: 5, 40>}, {pipeline_mode = #tpu.pipeline_mode<synchronous>, transform_indices = @transform_4, window_bounds = array<i64: 8, 1>}, {pipeline_mode = #tpu.pipeline_mode<synchronous>, transform_indices = @transform_5, window_bounds = array<i64: 8, 16>}, {pipeline_mode = #tpu.pipeline_mode<synchronous>, transform_indices = @transform_6, window_bounds = array<i64: 8, 4>}, {transform_indices = @transform_7, window_bounds = array<i64: 1, 2, 128>}, {transform_indices = @transform_8, window_bounds = array<i64: 1, 4, 4>}, {transform_indices = @transform_9, window_bounds = array<i64: 1, 4, 4>}]} {
    %c0 = arith.constant 0 : index
    %c0_0 = arith.constant 0 : index
    %c0_1 = arith.constant 0 : index
    %0 = vector.load %arg2[%c0, %c0_0, %c0_1] : memref<1x8x8xf32, #tpu.memory_space<vmem>>, vector<1x8x8xf32>
    %1 = vector.shape_cast %0 : vector<1x8x8xf32> to vector<8x8xf32>
    %c0_2 = arith.constant 0 : index
    %c0_3 = arith.constant 0 : index
    %c0_4 = arith.constant 0 : index
    %2 = vector.load %arg3[%c0_2, %c0_3, %c0_4] : memref<1x8x8xf32, #tpu.memory_space<vmem>>, vector<1x8x8xf32>
    %3 = vector.shape_cast %2 : vector<1x8x8xf32> to vector<8x8xf32>
    %c0_5 = arith.constant 0 : index
    %4 = memref.load %arg1[%c0_5] : memref<2xf32, #tpu.memory_space<smem>>
    %c1 = arith.constant 1 : index
    %5 = memref.load %arg1[%c1] : memref<2xf32, #tpu.memory_space<smem>>
    %6 = arith.mulf %1, %1 : vector<8x8xf32>
    %7 = arith.mulf %3, %3 : vector<8x8xf32>
    %8 = arith.mulf %1, %3 : vector<8x8xf32>
    %9 = tpu.concatenate %1, %3, %6, %7, %8 in 0 : vector<8x8xf32>, vector<8x8xf32>, vector<8x8xf32>, vector<8x8xf32>, vector<8x8xf32> -> vector<40x8xf32>
    %c0_6 = arith.constant 0 : index
    %c0_7 = arith.constant 0 : index
    %10 = vector.load %arg4[%c0_6, %c0_7] : memref<5x40xf32, #tpu.memory_space<vmem>>, vector<5x40xf32>
    %cst = arith.constant dense<0.000000e+00> : vector<5x8xf32>
    %11 = tpu.matmul %10, %9, %cst {dimension_numbers = #tpu.dot_dimension_numbers<[1], [0], [0], [1], [0, 0, 1, 1], [], []>} : vector<5x40xf32>, vector<40x8xf32>, vector<5x8xf32> -> vector<5x8xf32>
    %c0_8 = arith.constant 0 : index
    %c0_9 = arith.constant 0 : index
    %12 = vector.load %arg5[%c0_8, %c0_9] : memref<8x1xf32, #tpu.memory_space<vmem>>, vector<8x1xf32>
    %cst_10 = arith.constant dense<0.000000e+00> : vector<5x1xf32>
    %13 = tpu.matmul %11, %12, %cst_10 {dimension_numbers = #tpu.dot_dimension_numbers<[1], [0], [0], [1], [0, 0, 1, 1], [], []>} : vector<5x8xf32>, vector<8x1xf32>, vector<5x1xf32> -> vector<5x1xf32>
    %14 = vector.extract_strided_slice %13 {offsets = [0, 0], sizes = [1, 1], strides = [1, 1]} : vector<5x1xf32> to vector<1x1xf32>
    %15 = vector.extract_strided_slice %13 {offsets = [1, 0], sizes = [1, 1], strides = [1, 1]} : vector<5x1xf32> to vector<1x1xf32>
    %16 = vector.extract_strided_slice %13 {offsets = [2, 0], sizes = [1, 1], strides = [1, 1]} : vector<5x1xf32> to vector<1x1xf32>
    %17 = vector.extract_strided_slice %13 {offsets = [3, 0], sizes = [1, 1], strides = [1, 1]} : vector<5x1xf32> to vector<1x1xf32>
    %18 = vector.extract_strided_slice %13 {offsets = [4, 0], sizes = [1, 1], strides = [1, 1]} : vector<5x1xf32> to vector<1x1xf32>
    %19 = arith.mulf %14, %14 : vector<1x1xf32>
    %20 = arith.mulf %15, %15 : vector<1x1xf32>
    %21 = arith.mulf %14, %15 : vector<1x1xf32>
    %22 = arith.subf %16, %19 : vector<1x1xf32>
    %23 = arith.subf %17, %20 : vector<1x1xf32>
    %24 = arith.subf %18, %21 : vector<1x1xf32>
    %cst_11 = arith.constant 2.000000e+00 : f32
    %25 = vector.broadcast %cst_11 : f32 to vector<1x1xf32>
    %26 = arith.mulf %25, %24 : vector<1x1xf32>
    %27 = vector.broadcast %5 : f32 to vector<1x1xf32>
    %28 = arith.addf %26, %27 : vector<1x1xf32>
    %29 = arith.addf %22, %23 : vector<1x1xf32>
    %30 = vector.broadcast %5 : f32 to vector<1x1xf32>
    %31 = arith.addf %29, %30 : vector<1x1xf32>
    %32 = tpu.reciprocal %31 {approx = true} : vector<1x1xf32> -> vector<1x1xf32>
    %33 = arith.mulf %28, %32 : vector<1x1xf32>
    %cst_12 = arith.constant 2.000000e+00 : f32
    %34 = vector.broadcast %cst_12 : f32 to vector<1x1xf32>
    %35 = arith.mulf %34, %21 : vector<1x1xf32>
    %36 = vector.broadcast %4 : f32 to vector<1x1xf32>
    %37 = arith.addf %35, %36 : vector<1x1xf32>
    %38 = arith.mulf %37, %33 : vector<1x1xf32>
    %39 = arith.addf %19, %20 : vector<1x1xf32>
    %40 = vector.broadcast %4 : f32 to vector<1x1xf32>
    %41 = arith.addf %39, %40 : vector<1x1xf32>
    %42 = tpu.reciprocal %41 {approx = true} : vector<1x1xf32> -> vector<1x1xf32>
    %43 = arith.mulf %38, %42 : vector<1x1xf32>
    %44 = vector.shape_cast %43 : vector<1x1xf32> to vector<1x1x1xf32>
    %cst_13 = arith.constant dense<0.000000e+00> : vector<1xf32>
    %45 = vector.multi_reduction <add>, %44, %cst_13 [1, 2] : vector<1x1x1xf32> to vector<1xf32>
    %46 = vector.shape_cast %45 : vector<1xf32> to vector<1x1x1xf32>
    %47 = vector.extract %46[0, 0, 0] : f32 from vector<1x1x1xf32>
    %48 = vector.shape_cast %33 : vector<1x1xf32> to vector<1x1x1xf32>
    %cst_14 = arith.constant dense<0.000000e+00> : vector<1xf32>
    %49 = vector.multi_reduction <add>, %48, %cst_14 [1, 2] : vector<1x1x1xf32> to vector<1xf32>
    %50 = vector.shape_cast %49 : vector<1xf32> to vector<1x1x1xf32>
    %51 = vector.extract %50[0, 0, 0] : f32 from vector<1x1x1xf32>
    %52 = vector.broadcast %47 : f32 to vector<1x128xf32>
    %53 = vector.broadcast %51 : f32 to vector<1x128xf32>
    %54 = tpu.concatenate %52, %53 in 0 : vector<1x128xf32>, vector<1x128xf32> -> vector<2x128xf32>
    %c0_15 = arith.constant 0 : index
    %c0_16 = arith.constant 0 : index
    %c0_17 = arith.constant 0 : index
    %55 = vector.load %arg8[%c0_15, %c0_16, %c0_17] : memref<1x2x128xf32, #tpu.memory_space<vmem>>, vector<1x2x128xf32>
    %56 = vector.shape_cast %55 : vector<1x2x128xf32> to vector<2x128xf32>
    %57 = vector.shape_cast %54 : vector<2x128xf32> to vector<1x2x128xf32>
    tpu.vector_store %arg8[%c0_15, %c0_16, %c0_17], %57 {strides = array<i32>} : memref<1x2x128xf32, #tpu.memory_space<vmem>>, vector<1x2x128xf32>,
    %58 = vector.extract_strided_slice %9 {offsets = [0, 0], sizes = [16, 8], strides = [1, 1]} : vector<40x8xf32> to vector<16x8xf32>
    %c0_18 = arith.constant 0 : index
    %c0_19 = arith.constant 0 : index
    %59 = vector.load %arg6[%c0_18, %c0_19] : memref<8x16xf32, #tpu.memory_space<vmem>>, vector<8x16xf32>
    %cst_20 = arith.constant dense<0.000000e+00> : vector<8x8xf32>
    %60 = tpu.matmul %59, %58, %cst_20 {dimension_numbers = #tpu.dot_dimension_numbers<[1], [0], [0], [1], [0, 0, 1, 1], [], []>} : vector<8x16xf32>, vector<16x8xf32>, vector<8x8xf32> -> vector<8x8xf32>
    %c0_21 = arith.constant 0 : index
    %c0_22 = arith.constant 0 : index
    %61 = vector.load %arg7[%c0_21, %c0_22] : memref<8x4xf32, #tpu.memory_space<vmem>>, vector<8x4xf32>
    %cst_23 = arith.constant dense<0.000000e+00> : vector<8x4xf32>
    %62 = tpu.matmul %60, %61, %cst_23 {dimension_numbers = #tpu.dot_dimension_numbers<[1], [0], [0], [1], [0, 0, 1, 1], [], []>} : vector<8x8xf32>, vector<8x4xf32>, vector<8x4xf32> -> vector<8x4xf32>
    %63 = vector.extract_strided_slice %62 {offsets = [0, 0], sizes = [4, 4], strides = [1, 1]} : vector<8x4xf32> to vector<4x4xf32>
    %c0_24 = arith.constant 0 : index
    %c0_25 = arith.constant 0 : index
    %c0_26 = arith.constant 0 : index
    %64 = vector.load %arg9[%c0_24, %c0_25, %c0_26] : memref<1x4x4xf32, #tpu.memory_space<vmem>>, vector<1x4x4xf32>
    %65 = vector.shape_cast %64 : vector<1x4x4xf32> to vector<4x4xf32>
    %66 = vector.shape_cast %63 : vector<4x4xf32> to vector<1x4x4xf32>
    tpu.vector_store %arg9[%c0_24, %c0_25, %c0_26], %66 {strides = array<i32>} : memref<1x4x4xf32, #tpu.memory_space<vmem>>, vector<1x4x4xf32>,
    %67 = vector.extract_strided_slice %62 {offsets = [4, 0], sizes = [4, 4], strides = [1, 1]} : vector<8x4xf32> to vector<4x4xf32>
    %c0_27 = arith.constant 0 : index
    %c0_28 = arith.constant 0 : index
    %c0_29 = arith.constant 0 : index
    %68 = vector.load %arg10[%c0_27, %c0_28, %c0_29] : memref<1x4x4xf32, #tpu.memory_space<vmem>>, vector<1x4x4xf32>
    %69 = vector.shape_cast %68 : vector<1x4x4xf32> to vector<4x4xf32>
    %70 = vector.shape_cast %67 : vector<4x4xf32> to vector<1x4x4xf32>
    tpu.vector_store %arg10[%c0_27, %c0_28, %c0_29], %70 {strides = array<i32>} : memref<1x4x4xf32, #tpu.memory_space<vmem>>, vector<1x4x4xf32>,
    return
  }
  func.func @transform_0(%arg0: i32) -> i32 {
    %c0_i32 = arith.constant 0 : i32
    %c0_i32_0 = arith.constant 0 : i32
    return %c0_i32 : i32
  }
  func.func @transform_1(%arg0: i32) -> (i32, i32, i32) {
    %c0_i32 = arith.constant 0 : i32
    %c0_i32_0 = arith.constant 0 : i32
    %c0_i32_1 = arith.constant 0 : i32
    return %arg0, %c0_i32, %c0_i32_0 : i32, i32, i32
  }
  func.func @transform_2(%arg0: i32) -> (i32, i32, i32) {
    %c0_i32 = arith.constant 0 : i32
    %c0_i32_0 = arith.constant 0 : i32
    %c0_i32_1 = arith.constant 0 : i32
    return %arg0, %c0_i32, %c0_i32_0 : i32, i32, i32
  }
  func.func @transform_3(%arg0: i32) -> (i32, i32) {
    %c0_i32 = arith.constant 0 : i32
    %c0_i32_0 = arith.constant 0 : i32
    %c0_i32_1 = arith.constant 0 : i32
    return %c0_i32, %c0_i32_0 : i32, i32
  }
  func.func @transform_4(%arg0: i32) -> (i32, i32) {
    %c0_i32 = arith.constant 0 : i32
    %c0_i32_0 = arith.constant 0 : i32
    %c0_i32_1 = arith.constant 0 : i32
    return %c0_i32, %c0_i32_0 : i32, i32
  }
  func.func @transform_5(%arg0: i32) -> (i32, i32) {
    %c0_i32 = arith.constant 0 : i32
    %c0_i32_0 = arith.constant 0 : i32
    %c0_i32_1 = arith.constant 0 : i32
    return %c0_i32, %c0_i32_0 : i32, i32
  }
  func.func @transform_6(%arg0: i32) -> (i32, i32) {
    %c0_i32 = arith.constant 0 : i32
    %c0_i32_0 = arith.constant 0 : i32
    %c0_i32_1 = arith.constant 0 : i32
    return %c0_i32, %c0_i32_0 : i32, i32
  }
  func.func @transform_7(%arg0: i32) -> (i32, i32, i32) {
    %c0_i32 = arith.constant 0 : i32
    %c0_i32_0 = arith.constant 0 : i32
    %c0_i32_1 = arith.constant 0 : i32
    return %arg0, %c0_i32, %c0_i32_0 : i32, i32, i32
  }
  func.func @transform_8(%arg0: i32) -> (i32, i32, i32) {
    %c0_i32 = arith.constant 0 : i32
    %c0_i32_0 = arith.constant 0 : i32
    %c0_i32_1 = arith.constant 0 : i32
    return %arg0, %c0_i32, %c0_i32_0 : i32, i32, i32
  }
  func.func @transform_9(%arg0: i32) -> (i32, i32, i32) {
    %c0_i32 = arith.constant 0 : i32
    %c0_i32_0 = arith.constant 0 : i32
    %c0_i32_1 = arith.constant 0 : i32
    return %arg0, %c0_i32, %c0_i32_0 : i32, i32, i32
  }
}

module attributes {stable_mosaic.version = 11 : i64} {
  func.func @_level_kernel(%arg0: i32, %arg1: memref<2xf32, #tpu.memory_space<smem>>, %arg2: memref<1x4x4xf32, #tpu.memory_space<vmem>>, %arg3: memref<1x4x4xf32, #tpu.memory_space<vmem>>, %arg4: memref<5x20xf32, #tpu.memory_space<vmem>>, %arg5: memref<4x1xf32, #tpu.memory_space<vmem>>, %arg6: memref<4x8xf32, #tpu.memory_space<vmem>>, %arg7: memref<4x2xf32, #tpu.memory_space<vmem>>, %arg8: memref<1x2x128xf32, #tpu.memory_space<vmem>>, %arg9: memref<1x2x2xf32, #tpu.memory_space<vmem>>, %arg10: memref<1x2x2xf32, #tpu.memory_space<vmem>>) attributes {dimension_semantics = [#tpu.dimension_semantics<parallel>], iteration_bounds = array<i64: 6>, scalar_prefetch = 0 : i64, scratch_operands = 0 : i64, tpu.core_type = #tpu.core_type<tc>, window_params = [{transform_indices = @transform_0, window_bounds = array<i64: 2>}, {transform_indices = @transform_1, window_bounds = array<i64: 1, 4, 4>}, {transform_indices = @transform_2, window_bounds = array<i64: 1, 4, 4>}, {pipeline_mode = #tpu.pipeline_mode<synchronous>, transform_indices = @transform_3, window_bounds = array<i64: 5, 20>}, {pipeline_mode = #tpu.pipeline_mode<synchronous>, transform_indices = @transform_4, window_bounds = array<i64: 4, 1>}, {pipeline_mode = #tpu.pipeline_mode<synchronous>, transform_indices = @transform_5, window_bounds = array<i64: 4, 8>}, {pipeline_mode = #tpu.pipeline_mode<synchronous>, transform_indices = @transform_6, window_bounds = array<i64: 4, 2>}, {transform_indices = @transform_7, window_bounds = array<i64: 1, 2, 128>}, {transform_indices = @transform_8, window_bounds = array<i64: 1, 2, 2>}, {transform_indices = @transform_9, window_bounds = array<i64: 1, 2, 2>}]} {
    %c0 = arith.constant 0 : index
    %c0_0 = arith.constant 0 : index
    %c0_1 = arith.constant 0 : index
    %0 = vector.load %arg2[%c0, %c0_0, %c0_1] : memref<1x4x4xf32, #tpu.memory_space<vmem>>, vector<1x4x4xf32>
    %1 = vector.shape_cast %0 : vector<1x4x4xf32> to vector<4x4xf32>
    %c0_2 = arith.constant 0 : index
    %c0_3 = arith.constant 0 : index
    %c0_4 = arith.constant 0 : index
    %2 = vector.load %arg3[%c0_2, %c0_3, %c0_4] : memref<1x4x4xf32, #tpu.memory_space<vmem>>, vector<1x4x4xf32>
    %3 = vector.shape_cast %2 : vector<1x4x4xf32> to vector<4x4xf32>
    %c0_5 = arith.constant 0 : index
    %4 = memref.load %arg1[%c0_5] : memref<2xf32, #tpu.memory_space<smem>>
    %c1 = arith.constant 1 : index
    %5 = memref.load %arg1[%c1] : memref<2xf32, #tpu.memory_space<smem>>
    %6 = arith.mulf %1, %1 : vector<4x4xf32>
    %7 = arith.mulf %3, %3 : vector<4x4xf32>
    %8 = arith.mulf %1, %3 : vector<4x4xf32>
    %9 = tpu.concatenate %1, %3, %6, %7, %8 in 0 : vector<4x4xf32>, vector<4x4xf32>, vector<4x4xf32>, vector<4x4xf32>, vector<4x4xf32> -> vector<20x4xf32>
    %c0_6 = arith.constant 0 : index
    %c0_7 = arith.constant 0 : index
    %10 = vector.load %arg4[%c0_6, %c0_7] : memref<5x20xf32, #tpu.memory_space<vmem>>, vector<5x20xf32>
    %cst = arith.constant dense<0.000000e+00> : vector<5x4xf32>
    %11 = tpu.matmul %10, %9, %cst {dimension_numbers = #tpu.dot_dimension_numbers<[1], [0], [0], [1], [0, 0, 1, 1], [], []>} : vector<5x20xf32>, vector<20x4xf32>, vector<5x4xf32> -> vector<5x4xf32>
    %c0_8 = arith.constant 0 : index
    %c0_9 = arith.constant 0 : index
    %12 = vector.load %arg5[%c0_8, %c0_9] : memref<4x1xf32, #tpu.memory_space<vmem>>, vector<4x1xf32>
    %cst_10 = arith.constant dense<0.000000e+00> : vector<5x1xf32>
    %13 = tpu.matmul %11, %12, %cst_10 {dimension_numbers = #tpu.dot_dimension_numbers<[1], [0], [0], [1], [0, 0, 1, 1], [], []>} : vector<5x4xf32>, vector<4x1xf32>, vector<5x1xf32> -> vector<5x1xf32>
    %14 = vector.extract_strided_slice %13 {offsets = [0, 0], sizes = [1, 1], strides = [1, 1]} : vector<5x1xf32> to vector<1x1xf32>
    %15 = vector.extract_strided_slice %13 {offsets = [1, 0], sizes = [1, 1], strides = [1, 1]} : vector<5x1xf32> to vector<1x1xf32>
    %16 = vector.extract_strided_slice %13 {offsets = [2, 0], sizes = [1, 1], strides = [1, 1]} : vector<5x1xf32> to vector<1x1xf32>
    %17 = vector.extract_strided_slice %13 {offsets = [3, 0], sizes = [1, 1], strides = [1, 1]} : vector<5x1xf32> to vector<1x1xf32>
    %18 = vector.extract_strided_slice %13 {offsets = [4, 0], sizes = [1, 1], strides = [1, 1]} : vector<5x1xf32> to vector<1x1xf32>
    %19 = arith.mulf %14, %14 : vector<1x1xf32>
    %20 = arith.mulf %15, %15 : vector<1x1xf32>
    %21 = arith.mulf %14, %15 : vector<1x1xf32>
    %22 = arith.subf %16, %19 : vector<1x1xf32>
    %23 = arith.subf %17, %20 : vector<1x1xf32>
    %24 = arith.subf %18, %21 : vector<1x1xf32>
    %cst_11 = arith.constant 2.000000e+00 : f32
    %25 = vector.broadcast %cst_11 : f32 to vector<1x1xf32>
    %26 = arith.mulf %25, %24 : vector<1x1xf32>
    %27 = vector.broadcast %5 : f32 to vector<1x1xf32>
    %28 = arith.addf %26, %27 : vector<1x1xf32>
    %29 = arith.addf %22, %23 : vector<1x1xf32>
    %30 = vector.broadcast %5 : f32 to vector<1x1xf32>
    %31 = arith.addf %29, %30 : vector<1x1xf32>
    %32 = tpu.reciprocal %31 {approx = true} : vector<1x1xf32> -> vector<1x1xf32>
    %33 = arith.mulf %28, %32 : vector<1x1xf32>
    %cst_12 = arith.constant 2.000000e+00 : f32
    %34 = vector.broadcast %cst_12 : f32 to vector<1x1xf32>
    %35 = arith.mulf %34, %21 : vector<1x1xf32>
    %36 = vector.broadcast %4 : f32 to vector<1x1xf32>
    %37 = arith.addf %35, %36 : vector<1x1xf32>
    %38 = arith.mulf %37, %33 : vector<1x1xf32>
    %39 = arith.addf %19, %20 : vector<1x1xf32>
    %40 = vector.broadcast %4 : f32 to vector<1x1xf32>
    %41 = arith.addf %39, %40 : vector<1x1xf32>
    %42 = tpu.reciprocal %41 {approx = true} : vector<1x1xf32> -> vector<1x1xf32>
    %43 = arith.mulf %38, %42 : vector<1x1xf32>
    %44 = vector.shape_cast %43 : vector<1x1xf32> to vector<1x1x1xf32>
    %cst_13 = arith.constant dense<0.000000e+00> : vector<1xf32>
    %45 = vector.multi_reduction <add>, %44, %cst_13 [1, 2] : vector<1x1x1xf32> to vector<1xf32>
    %46 = vector.shape_cast %45 : vector<1xf32> to vector<1x1x1xf32>
    %47 = vector.extract %46[0, 0, 0] : f32 from vector<1x1x1xf32>
    %48 = vector.shape_cast %33 : vector<1x1xf32> to vector<1x1x1xf32>
    %cst_14 = arith.constant dense<0.000000e+00> : vector<1xf32>
    %49 = vector.multi_reduction <add>, %48, %cst_14 [1, 2] : vector<1x1x1xf32> to vector<1xf32>
    %50 = vector.shape_cast %49 : vector<1xf32> to vector<1x1x1xf32>
    %51 = vector.extract %50[0, 0, 0] : f32 from vector<1x1x1xf32>
    %52 = vector.broadcast %47 : f32 to vector<1x128xf32>
    %53 = vector.broadcast %51 : f32 to vector<1x128xf32>
    %54 = tpu.concatenate %52, %53 in 0 : vector<1x128xf32>, vector<1x128xf32> -> vector<2x128xf32>
    %c0_15 = arith.constant 0 : index
    %c0_16 = arith.constant 0 : index
    %c0_17 = arith.constant 0 : index
    %55 = vector.load %arg8[%c0_15, %c0_16, %c0_17] : memref<1x2x128xf32, #tpu.memory_space<vmem>>, vector<1x2x128xf32>
    %56 = vector.shape_cast %55 : vector<1x2x128xf32> to vector<2x128xf32>
    %57 = vector.shape_cast %54 : vector<2x128xf32> to vector<1x2x128xf32>
    tpu.vector_store %arg8[%c0_15, %c0_16, %c0_17], %57 {strides = array<i32>} : memref<1x2x128xf32, #tpu.memory_space<vmem>>, vector<1x2x128xf32>,
    %58 = vector.extract_strided_slice %9 {offsets = [0, 0], sizes = [8, 4], strides = [1, 1]} : vector<20x4xf32> to vector<8x4xf32>
    %c0_18 = arith.constant 0 : index
    %c0_19 = arith.constant 0 : index
    %59 = vector.load %arg6[%c0_18, %c0_19] : memref<4x8xf32, #tpu.memory_space<vmem>>, vector<4x8xf32>
    %cst_20 = arith.constant dense<0.000000e+00> : vector<4x4xf32>
    %60 = tpu.matmul %59, %58, %cst_20 {dimension_numbers = #tpu.dot_dimension_numbers<[1], [0], [0], [1], [0, 0, 1, 1], [], []>} : vector<4x8xf32>, vector<8x4xf32>, vector<4x4xf32> -> vector<4x4xf32>
    %c0_21 = arith.constant 0 : index
    %c0_22 = arith.constant 0 : index
    %61 = vector.load %arg7[%c0_21, %c0_22] : memref<4x2xf32, #tpu.memory_space<vmem>>, vector<4x2xf32>
    %cst_23 = arith.constant dense<0.000000e+00> : vector<4x2xf32>
    %62 = tpu.matmul %60, %61, %cst_23 {dimension_numbers = #tpu.dot_dimension_numbers<[1], [0], [0], [1], [0, 0, 1, 1], [], []>} : vector<4x4xf32>, vector<4x2xf32>, vector<4x2xf32> -> vector<4x2xf32>
    %63 = vector.extract_strided_slice %62 {offsets = [0, 0], sizes = [2, 2], strides = [1, 1]} : vector<4x2xf32> to vector<2x2xf32>
    %c0_24 = arith.constant 0 : index
    %c0_25 = arith.constant 0 : index
    %c0_26 = arith.constant 0 : index
    %64 = vector.load %arg9[%c0_24, %c0_25, %c0_26] : memref<1x2x2xf32, #tpu.memory_space<vmem>>, vector<1x2x2xf32>
    %65 = vector.shape_cast %64 : vector<1x2x2xf32> to vector<2x2xf32>
    %66 = vector.shape_cast %63 : vector<2x2xf32> to vector<1x2x2xf32>
    tpu.vector_store %arg9[%c0_24, %c0_25, %c0_26], %66 {strides = array<i32>} : memref<1x2x2xf32, #tpu.memory_space<vmem>>, vector<1x2x2xf32>,
    %67 = vector.extract_strided_slice %62 {offsets = [2, 0], sizes = [2, 2], strides = [1, 1]} : vector<4x2xf32> to vector<2x2xf32>
    %c0_27 = arith.constant 0 : index
    %c0_28 = arith.constant 0 : index
    %c0_29 = arith.constant 0 : index
    %68 = vector.load %arg10[%c0_27, %c0_28, %c0_29] : memref<1x2x2xf32, #tpu.memory_space<vmem>>, vector<1x2x2xf32>
    %69 = vector.shape_cast %68 : vector<1x2x2xf32> to vector<2x2xf32>
    %70 = vector.shape_cast %67 : vector<2x2xf32> to vector<1x2x2xf32>
    tpu.vector_store %arg10[%c0_27, %c0_28, %c0_29], %70 {strides = array<i32>} : memref<1x2x2xf32, #tpu.memory_space<vmem>>, vector<1x2x2xf32>,
    return
  }
  func.func @transform_0(%arg0: i32) -> i32 {
    %c0_i32 = arith.constant 0 : i32
    %c0_i32_0 = arith.constant 0 : i32
    return %c0_i32 : i32
  }
  func.func @transform_1(%arg0: i32) -> (i32, i32, i32) {
    %c0_i32 = arith.constant 0 : i32
    %c0_i32_0 = arith.constant 0 : i32
    %c0_i32_1 = arith.constant 0 : i32
    return %arg0, %c0_i32, %c0_i32_0 : i32, i32, i32
  }
  func.func @transform_2(%arg0: i32) -> (i32, i32, i32) {
    %c0_i32 = arith.constant 0 : i32
    %c0_i32_0 = arith.constant 0 : i32
    %c0_i32_1 = arith.constant 0 : i32
    return %arg0, %c0_i32, %c0_i32_0 : i32, i32, i32
  }
  func.func @transform_3(%arg0: i32) -> (i32, i32) {
    %c0_i32 = arith.constant 0 : i32
    %c0_i32_0 = arith.constant 0 : i32
    %c0_i32_1 = arith.constant 0 : i32
    return %c0_i32, %c0_i32_0 : i32, i32
  }
  func.func @transform_4(%arg0: i32) -> (i32, i32) {
    %c0_i32 = arith.constant 0 : i32
    %c0_i32_0 = arith.constant 0 : i32
    %c0_i32_1 = arith.constant 0 : i32
    return %c0_i32, %c0_i32_0 : i32, i32
  }
  func.func @transform_5(%arg0: i32) -> (i32, i32) {
    %c0_i32 = arith.constant 0 : i32
    %c0_i32_0 = arith.constant 0 : i32
    %c0_i32_1 = arith.constant 0 : i32
    return %c0_i32, %c0_i32_0 : i32, i32
  }
  func.func @transform_6(%arg0: i32) -> (i32, i32) {
    %c0_i32 = arith.constant 0 : i32
    %c0_i32_0 = arith.constant 0 : i32
    %c0_i32_1 = arith.constant 0 : i32
    return %c0_i32, %c0_i32_0 : i32, i32
  }
  func.func @transform_7(%arg0: i32) -> (i32, i32, i32) {
    %c0_i32 = arith.constant 0 : i32
    %c0_i32_0 = arith.constant 0 : i32
    %c0_i32_1 = arith.constant 0 : i32
    return %arg0, %c0_i32, %c0_i32_0 : i32, i32, i32
  }
  func.func @transform_8(%arg0: i32) -> (i32, i32, i32) {
    %c0_i32 = arith.constant 0 : i32
    %c0_i32_0 = arith.constant 0 : i32
    %c0_i32_1 = arith.constant 0 : i32
    return %arg0, %c0_i32, %c0_i32_0 : i32, i32, i32
  }
  func.func @transform_9(%arg0: i32) -> (i32, i32, i32) {
    %c0_i32 = arith.constant 0 : i32
    %c0_i32_0 = arith.constant 0 : i32
    %c0_i32_1 = arith.constant 0 : i32
    return %arg0, %c0_i32, %c0_i32_0 : i32, i32, i32
  }
}

module attributes {stable_mosaic.version = 11 : i64} {
  func.func @_level_kernel(%arg0: i32, %arg1: memref<2xf32, #tpu.memory_space<smem>>, %arg2: memref<1x2x2xf32, #tpu.memory_space<vmem>>, %arg3: memref<1x2x2xf32, #tpu.memory_space<vmem>>, %arg4: memref<5x10xf32, #tpu.memory_space<vmem>>, %arg5: memref<2x1xf32, #tpu.memory_space<vmem>>, %arg6: memref<1x2x128xf32, #tpu.memory_space<vmem>>) attributes {dimension_semantics = [#tpu.dimension_semantics<parallel>], iteration_bounds = array<i64: 6>, scalar_prefetch = 0 : i64, scratch_operands = 0 : i64, tpu.core_type = #tpu.core_type<tc>, window_params = [{transform_indices = @transform_0, window_bounds = array<i64: 2>}, {transform_indices = @transform_1, window_bounds = array<i64: 1, 2, 2>}, {transform_indices = @transform_2, window_bounds = array<i64: 1, 2, 2>}, {pipeline_mode = #tpu.pipeline_mode<synchronous>, transform_indices = @transform_3, window_bounds = array<i64: 5, 10>}, {pipeline_mode = #tpu.pipeline_mode<synchronous>, transform_indices = @transform_4, window_bounds = array<i64: 2, 1>}, {transform_indices = @transform_5, window_bounds = array<i64: 1, 2, 128>}]} {
    %c0 = arith.constant 0 : index
    %c0_0 = arith.constant 0 : index
    %c0_1 = arith.constant 0 : index
    %0 = vector.load %arg2[%c0, %c0_0, %c0_1] : memref<1x2x2xf32, #tpu.memory_space<vmem>>, vector<1x2x2xf32>
    %1 = vector.shape_cast %0 : vector<1x2x2xf32> to vector<2x2xf32>
    %c0_2 = arith.constant 0 : index
    %c0_3 = arith.constant 0 : index
    %c0_4 = arith.constant 0 : index
    %2 = vector.load %arg3[%c0_2, %c0_3, %c0_4] : memref<1x2x2xf32, #tpu.memory_space<vmem>>, vector<1x2x2xf32>
    %3 = vector.shape_cast %2 : vector<1x2x2xf32> to vector<2x2xf32>
    %c0_5 = arith.constant 0 : index
    %4 = memref.load %arg1[%c0_5] : memref<2xf32, #tpu.memory_space<smem>>
    %c1 = arith.constant 1 : index
    %5 = memref.load %arg1[%c1] : memref<2xf32, #tpu.memory_space<smem>>
    %6 = arith.mulf %1, %1 : vector<2x2xf32>
    %7 = arith.mulf %3, %3 : vector<2x2xf32>
    %8 = arith.mulf %1, %3 : vector<2x2xf32>
    %9 = tpu.concatenate %1, %3, %6, %7, %8 in 0 : vector<2x2xf32>, vector<2x2xf32>, vector<2x2xf32>, vector<2x2xf32>, vector<2x2xf32> -> vector<10x2xf32>
    %c0_6 = arith.constant 0 : index
    %c0_7 = arith.constant 0 : index
    %10 = vector.load %arg4[%c0_6, %c0_7] : memref<5x10xf32, #tpu.memory_space<vmem>>, vector<5x10xf32>
    %cst = arith.constant dense<0.000000e+00> : vector<5x2xf32>
    %11 = tpu.matmul %10, %9, %cst {dimension_numbers = #tpu.dot_dimension_numbers<[1], [0], [0], [1], [0, 0, 1, 1], [], []>} : vector<5x10xf32>, vector<10x2xf32>, vector<5x2xf32> -> vector<5x2xf32>
    %c0_8 = arith.constant 0 : index
    %c0_9 = arith.constant 0 : index
    %12 = vector.load %arg5[%c0_8, %c0_9] : memref<2x1xf32, #tpu.memory_space<vmem>>, vector<2x1xf32>
    %cst_10 = arith.constant dense<0.000000e+00> : vector<5x1xf32>
    %13 = tpu.matmul %11, %12, %cst_10 {dimension_numbers = #tpu.dot_dimension_numbers<[1], [0], [0], [1], [0, 0, 1, 1], [], []>} : vector<5x2xf32>, vector<2x1xf32>, vector<5x1xf32> -> vector<5x1xf32>
    %14 = vector.extract_strided_slice %13 {offsets = [0, 0], sizes = [1, 1], strides = [1, 1]} : vector<5x1xf32> to vector<1x1xf32>
    %15 = vector.extract_strided_slice %13 {offsets = [1, 0], sizes = [1, 1], strides = [1, 1]} : vector<5x1xf32> to vector<1x1xf32>
    %16 = vector.extract_strided_slice %13 {offsets = [2, 0], sizes = [1, 1], strides = [1, 1]} : vector<5x1xf32> to vector<1x1xf32>
    %17 = vector.extract_strided_slice %13 {offsets = [3, 0], sizes = [1, 1], strides = [1, 1]} : vector<5x1xf32> to vector<1x1xf32>
    %18 = vector.extract_strided_slice %13 {offsets = [4, 0], sizes = [1, 1], strides = [1, 1]} : vector<5x1xf32> to vector<1x1xf32>
    %19 = arith.mulf %14, %14 : vector<1x1xf32>
    %20 = arith.mulf %15, %15 : vector<1x1xf32>
    %21 = arith.mulf %14, %15 : vector<1x1xf32>
    %22 = arith.subf %16, %19 : vector<1x1xf32>
    %23 = arith.subf %17, %20 : vector<1x1xf32>
    %24 = arith.subf %18, %21 : vector<1x1xf32>
    %cst_11 = arith.constant 2.000000e+00 : f32
    %25 = vector.broadcast %cst_11 : f32 to vector<1x1xf32>
    %26 = arith.mulf %25, %24 : vector<1x1xf32>
    %27 = vector.broadcast %5 : f32 to vector<1x1xf32>
    %28 = arith.addf %26, %27 : vector<1x1xf32>
    %29 = arith.addf %22, %23 : vector<1x1xf32>
    %30 = vector.broadcast %5 : f32 to vector<1x1xf32>
    %31 = arith.addf %29, %30 : vector<1x1xf32>
    %32 = tpu.reciprocal %31 {approx = true} : vector<1x1xf32> -> vector<1x1xf32>
    %33 = arith.mulf %28, %32 : vector<1x1xf32>
    %cst_12 = arith.constant 2.000000e+00 : f32
    %34 = vector.broadcast %cst_12 : f32 to vector<1x1xf32>
    %35 = arith.mulf %34, %21 : vector<1x1xf32>
    %36 = vector.broadcast %4 : f32 to vector<1x1xf32>
    %37 = arith.addf %35, %36 : vector<1x1xf32>
    %38 = arith.mulf %37, %33 : vector<1x1xf32>
    %39 = arith.addf %19, %20 : vector<1x1xf32>
    %40 = vector.broadcast %4 : f32 to vector<1x1xf32>
    %41 = arith.addf %39, %40 : vector<1x1xf32>
    %42 = tpu.reciprocal %41 {approx = true} : vector<1x1xf32> -> vector<1x1xf32>
    %43 = arith.mulf %38, %42 : vector<1x1xf32>
    %44 = vector.shape_cast %43 : vector<1x1xf32> to vector<1x1x1xf32>
    %cst_13 = arith.constant dense<0.000000e+00> : vector<1xf32>
    %45 = vector.multi_reduction <add>, %44, %cst_13 [1, 2] : vector<1x1x1xf32> to vector<1xf32>
    %46 = vector.shape_cast %45 : vector<1xf32> to vector<1x1x1xf32>
    %47 = vector.extract %46[0, 0, 0] : f32 from vector<1x1x1xf32>
    %48 = vector.shape_cast %33 : vector<1x1xf32> to vector<1x1x1xf32>
    %cst_14 = arith.constant dense<0.000000e+00> : vector<1xf32>
    %49 = vector.multi_reduction <add>, %48, %cst_14 [1, 2] : vector<1x1x1xf32> to vector<1xf32>
    %50 = vector.shape_cast %49 : vector<1xf32> to vector<1x1x1xf32>
    %51 = vector.extract %50[0, 0, 0] : f32 from vector<1x1x1xf32>
    %52 = vector.broadcast %47 : f32 to vector<1x128xf32>
    %53 = vector.broadcast %51 : f32 to vector<1x128xf32>
    %54 = tpu.concatenate %52, %53 in 0 : vector<1x128xf32>, vector<1x128xf32> -> vector<2x128xf32>
    %c0_15 = arith.constant 0 : index
    %c0_16 = arith.constant 0 : index
    %c0_17 = arith.constant 0 : index
    %55 = vector.load %arg6[%c0_15, %c0_16, %c0_17] : memref<1x2x128xf32, #tpu.memory_space<vmem>>, vector<1x2x128xf32>
    %56 = vector.shape_cast %55 : vector<1x2x128xf32> to vector<2x128xf32>
    %57 = vector.shape_cast %54 : vector<2x128xf32> to vector<1x2x128xf32>
    tpu.vector_store %arg6[%c0_15, %c0_16, %c0_17], %57 {strides = array<i32>} : memref<1x2x128xf32, #tpu.memory_space<vmem>>, vector<1x2x128xf32>,
    return
  }
  func.func @transform_0(%arg0: i32) -> i32 {
    %c0_i32 = arith.constant 0 : i32
    %c0_i32_0 = arith.constant 0 : i32
    return %c0_i32 : i32
  }
  func.func @transform_1(%arg0: i32) -> (i32, i32, i32) {
    %c0_i32 = arith.constant 0 : i32
    %c0_i32_0 = arith.constant 0 : i32
    %c0_i32_1 = arith.constant 0 : i32
    return %arg0, %c0_i32, %c0_i32_0 : i32, i32, i32
  }
  func.func @transform_2(%arg0: i32) -> (i32, i32, i32) {
    %c0_i32 = arith.constant 0 : i32
    %c0_i32_0 = arith.constant 0 : i32
    %c0_i32_1 = arith.constant 0 : i32
    return %arg0, %c0_i32, %c0_i32_0 : i32, i32, i32
  }
  func.func @transform_3(%arg0: i32) -> (i32, i32) {
    %c0_i32 = arith.constant 0 : i32
    %c0_i32_0 = arith.constant 0 : i32
    %c0_i32_1 = arith.constant 0 : i32
    return %c0_i32, %c0_i32_0 : i32, i32
  }
  func.func @transform_4(%arg0: i32) -> (i32, i32) {
    %c0_i32 = arith.constant 0 : i32
    %c0_i32_0 = arith.constant 0 : i32
    %c0_i32_1 = arith.constant 0 : i32
    return %c0_i32, %c0_i32_0 : i32, i32
  }
  func.func @transform_5(%arg0: i32) -> (i32, i32, i32) {
    %c0_i32 = arith.constant 0 : i32
    %c0_i32_0 = arith.constant 0 : i32
    %c0_i32_1 = arith.constant 0 : i32
    return %arg0, %c0_i32, %c0_i32_0 : i32, i32, i32
  }
}

</mosaic_0001>

<bundles_post_ra>
// kernel: msssim.5
= control target key start
LH: loop header
LB: loop body
LE: loop exit
PB: predicated region body
PF: predicated region fallthrough
CT: control target
= control target key end

     0   :  { %s2179_s0 = inlined_call_operand.vmem [shape: f32[2], index: 0, kind: input, shape index: {}]   ;;  %s2180_s1 = inlined_call_operand.vmem [shape: f32[6,32,32], index: 1, kind: input, shape index: {}]   ;;  %s2181_s2 = inlined_call_operand.hbm [shape: f32[6,32,32], index: 2, kind: input, shape index: {}]   ;;  %s2182_s3 = inlined_call_operand.hbm [shape: f32[110,160], index: 3, kind: input, shape index: {}]   ;;  %s2183_s4 = inlined_call_operand.vmem [shape: f32[32,22], index: 4, kind: input, shape index: {}]   ;;  %s2184_s5 = inlined_call_operand.vmem [shape: f32[32,64], index: 5, kind: input, shape index: {}]   ;;  %s2185_s6 = inlined_call_operand.vmem [shape: f32[32,16], index: 6, kind: input, shape index: {}]   ;;  %s2186_s7 = inlined_call_operand.vmem [shape: f32[6,2,128], index: 7, kind: output, shape index: {0}]   ;;  %s2187_s8 = inlined_call_operand.vmem [shape: f32[6,16,16], index: 8, kind: output, shape index: {1}]   ;;  %s2188_s9 = inlined_call_operand.vmem [shape: f32[6,16,16], index: 9, kind: output, shape index: {2}]  }
   0x1   :  { %2191 = sst [smem:[#allocation12_spill]] %s2179_s0 }
   0x2   :  { %15 = vsyncpa [#allocation4], 0 }
   0x3   :  { %16 = vsyncpa [#allocation3], 0 }
   0x4   :  { %18 = vsyncpa [#allocation3 + $0x1], 0 }
   0x5   :  { %19 = vsyncpa [#allocation7], 0  ;;  %s1866_s30 = smov 0   ;;  %s1868_s10 = smov 0  }
   0x6   :  { %s1870_s11 = smov 0   ;;  %s1872_s12 = smov 0  }
   0x7 LB: > { %s1885_s13 = sadd.s32 4294967295, %s1806_s12   ;;  %s1888_s14 = sadd.s32 1, %s1806_s12   ;;  %s1806_s12 = sphi %s1872_s12, %s2208_s12   ;;  %s1802_s11 = sphi %s1870_s11, %s2207_s11   ;;  %s1798_s10 = sphi %s1868_s10, %s2206_s10   ;;  %s1794_s30 = sphi %s1866_s30, %s2205_s30  }
   0x8   : > { %s76_s15 = ssub.s32 %s1806_s12, %s1888_s14  ;;  %s79_s16 = sadd.s32 1, %s1802_s11 }
   0x9   : > { %p77_p0 = scmp.eq.s32.totalorder %s76_s15, 0  ;;  %p86_p1 = scmp.ne.s32.totalorder %s1802_s11, %s1798_s10 }
   0xa   : > { %p87_p2 = scmp.eq.s32.totalorder %s1806_s12, 0  ;;  %p92_p3 = scmp.ne.s32.totalorder %s1798_s10, %s1794_s30 }
   0xb   : > { %s1898_s17 = scalar_select %p77_p0, %s1802_s11, %s79_s16  }
   0xc   : > { %p1900_p4 = por %p87_p2, %p86_p1  ;;  %p2189_p5 = scmp.eq.s32.totalorder %s1885_s13, 0 }
   0xd   : > { %2192 = sst [smem:[#allocation11_spill]] %s1898_s17  ;;  %p1382_p6 = scmp.ge.s32.totalorder %s1806_s12, 1 }
   0xe   : > { %p265_p7 = scmp.lt.s32.totalorder %s1806_s12, 7  ;;  %p1909_p8 = por %p2189_p5, %p92_p3 }
   0xf   : > { %s2196_s0 = sld [smem:[#allocation12_spill]]  ;;  %p1635_p11 = scmp.lt.s32.totalorder %s1806_s12, 6 }
  0x10   : > { %s2194_s19 = scalar_select %p1909_p8, 1, 0 }
  0x11   : > { %p1913_p9 = pnand %p1382_p6, %p265_p7  ;;  %s1808_s25 = smov [#allocation6]  }
  0x12   : > { %s288_s26 = sshll.u32 %s1808_s25, 4  ;;  %p1931_p13 = pnand %p1635_p11, %p1900_p4  ;;  %s1935_s26 = int_to_ptr.vmem [resolvable:$true] %s288_s26 }
  0x13   : > { %p1622_p10 = pneg %p1913_p9 }
  0x15   : > { %s278_s23 = sshll.u32 %s2196_s0, 4  ;;  %p1925_p12 = pnand %p1622_p10, %p2189_p5  ;;  %s279_s23 = int_to_ptr.vmem [resolvable:$true] %s278_s23 }
  0x16   : > { %s1691_s28 = scalar_lea.vmem %s279_s23, 16  ;;  %p1699_p6 = scmp.lt.s32.totalorder %s279_s23, %s279_s23 }
  0x17   : > { %p1692_p0 = scmp.ne.s32.totalorder %s279_s23, %s1691_s28  ;;  %p1693_p1 = pneg %p1925_p12 }
  0x18   : > { %p1700_p7 = scmp.lt.s32.totalorder %s1691_s28, %s1691_s28 }
  0x19   : > { %p1694_p2 = pnand %p1693_p1, %p1692_p0 }
  0x1a   : > { %p1701_p10 = por %p1700_p7, %p1699_p6 }
  0x1b   : > { %p1695_p3 = pneg %p1694_p2 }
  0x1d   : > { %p1702_p5 = pnand %p1701_p10, %p1695_p3 }
  0x1f   : > { %1705 = shalt.err (!%p1702_p5)
}
  0x20   : > { %s1809_s29 = smov [#allocation2]   ;;  %s1706_s16 = scalar_lea.hbm %s2182_s3, 3584 }
  0x21   : > { %1625 = dma.vmem_to_smem (!%p1925_p12), %s279_s23, 16, %s1809_s29, [#allocation4]  }
  0x22   : > { %p1707_p4 = scmp.ne.s32.totalorder %s2182_s3, %s1706_s16  ;;  %p1713_p5 = scmp.lt.u32.totalorder %s1706_s16, %s2182_s3 }
  0x24   : > { %p1709_p11 = pnand %p1707_p4, %p1693_p1 }
  0x26   : > { %p1710_p0 = pneg %p1709_p11 }
  0x28   : > { %p1715_p2 = pnand %p1713_p5, %p1710_p0 }
  0x2a   : > { %1718 = shalt.err (!%p1715_p2)
}
  0x2b   : > { %s1719_s23 = scalar_lea.vmem %s1935_s26, 3584  ;;  %p1727_p10 = scmp.lt.s32.totalorder %s1935_s26, %s1935_s26 }
  0x2c   : > { %p1720_p3 = scmp.ne.s32.totalorder %s1935_s26, %s1719_s23  ;;  %p1728_p4 = scmp.lt.s32.totalorder %s1719_s23, %s1719_s23 }
  0x2e   : > { %p1722_p6 = pnand %p1720_p3, %p1693_p1  ;;  %p1729_p11 = por %p1728_p4, %p1727_p10 }
  0x30   : > { %p1723_p7 = pneg %p1722_p6 }
  0x32   : > { %p1730_p8 = pnand %p1729_p11, %p1723_p7 }
  0x34   : > { %1733 = shalt.err (!%p1730_p8)
}
  0x35   : > { %s1810_s28 = smov 256   ;;  %s1811_s29 = smov 16  }
  0x36   : > { %1628 = dma.hbm_to_vmem [thread:$0]  (!%p1925_p12), %s2182_s3, 3584, %s1935_s26, [#allocation7], %s1810_s28, %s1810_s28, %s1811_s29  }
  0x37   : > { %s319_s16 = sand.u32 1, %s1802_s11   ;;  %s1439_s18 = sshll.u32 %s1806_s12, 9 }
  0x38   : > { %s1386_s21 = sshll.u32 %s319_s16, 5  ;;  %s1974_s23 = scalar_lea.hbm %s2181_s2, %s1439_s18 }
  0x39   : > { %s323_s0 = scalar_lea.vmem [#allocation5], %s1386_s21  ;;  %s1978_s24 = scalar_lea.sflag [#allocation3], %s319_s16 }
  0x3a   : > { %s330_s17 = sshll.u32 %s323_s0, 4  ;;  %s1734_s30 = scalar_lea.hbm %s1974_s23, 512  ;;  %s1976_s17 = int_to_ptr.vmem [resolvable:$true] %s330_s17 }
  0x3b   : > { %p1735_p8 = scmp.ne.s32.totalorder %s1974_s23, %s1734_s30  ;;  %p1736_p12 = pneg %p1931_p13 }
  0x3c   : > { %s1739_s28 = scalar_lea.hbm %s2181_s2, 3072  ;;  %p1740_p5 = scmp.lt.u32.totalorder %s1974_s23, %s2181_s2 }
  0x3d   : > { %p1737_p1 = pnand %p1736_p12, %p1735_p8  ;;  %p1741_p2 = scmp.lt.u32.totalorder %s1739_s28, %s1734_s30 }
  0x3e   : > { %p1743_p6 = scmp.lt.u32.totalorder %s1734_s30, %s1974_s23 }
  0x3f   : > { %p1738_p0 = pneg %p1737_p1  ;;  %p1742_p3 = por %p1741_p2, %p1740_p5 }
  0x41   : > { %p1744_p7 = por %p1743_p6, %p1742_p3 }
  0x43   : > { %p1745_p10 = pnand %p1744_p7, %p1738_p0 }
  0x45   : > { %1748 = shalt.err (!%p1745_p10)
}
  0x46   : > { %s1749_s0 = scalar_lea.vmem %s1976_s17, 512  ;;  %s1812_s16 = smov [#allocation5]  }
  0x47   : > { %p1750_p4 = scmp.ne.s32.totalorder %s1976_s17, %s1749_s0  ;;  %s1754_s18 = sshll.u32 %s1812_s16, 4  ;;  %s1755_s18 = int_to_ptr.vmem [resolvable:$false] %s1754_s18 }
  0x48   : > { %s1756_s21 = scalar_lea.vmem %s1755_s18, 1024  ;;  %p1757_p1 = scmp.lt.s32.totalorder %s1976_s17, %s1755_s18 }
  0x49   : > { %p1752_p11 = pnand %p1750_p4, %p1736_p12  ;;  %p1758_p5 = scmp.lt.s32.totalorder %s1756_s21, %s1749_s0 }
  0x4b   : > { %p1753_p8 = pneg %p1752_p11  ;;  %p1759_p2 = por %p1758_p5, %p1757_p1 }
  0x4d   : > { %p1760_p3 = pnand %p1759_p2, %p1753_p8 }
  0x4f   : > { %1763 = shalt.err (!%p1760_p3)
}
  0x50   : > { %s1813_s22 = smov 128   ;;  %s1814_s25 = smov 8  }
  0x51   : > { %1632 = dma.hbm_to_vmem [thread:$0]  (!%p1931_p13), %s1974_s23, 512, %s1976_s17, %s1978_s24, %s1813_s22, %s1813_s22, %s1814_s25  }
  0x52   : > { %342 = sbr.rel (%p1913_p9) target bundleno = 860 (0x35c), region = 48  ;;  %p2199_p12 = scmp.eq.s32.totalorder (!%p1913_p9), %s1885_s13, 0 }
  0x59   : > { %1781 = dma.done.wait (%p2199_p12), [#allocation4], 16   ;;  %p2200_p0 = pmov %p2199_p12 }
  0x5a   : > { %s348_s30 = sand.u32 1, %s1798_s10   ;;  %p2201_p6 = scmp.ne.s32.totalorder %s2194_s19, 0 }
  0x5b   : > { %1783 = vsyncadd (%p2200_p0), [#allocation4], 4294967280  ;;  %s1391_s12 = sshll.u32 %s348_s30, 5  ;;  %s349_s26 = scalar_lea.sflag [#allocation3], %s348_s30 }
  0x5c   : > { %s2013_s28 = scalar_lea.vmem [#allocation5], %s1391_s12 }
  0x5d   : > { %1785 = dma.done.wait (%p2201_p6), %s349_s26, 512  }
  0x5e   : > { %1787 = vsyncadd (%p2201_p6), %s349_s26, 4294966784  ;;  %p2202_p9 = pmov %p2200_p0 }
  0x5f   : > { %p2203_p13 = pmov %p2200_p0 }
  0x60   : > { %1789 = dma.done.wait (%p2202_p9), [#allocation7], 3584  }
  0x61   : > { %1791 = vsyncadd (%p2203_p13), [#allocation7], 4294963712 }
  0x62   : > { %361 = sfence }
  0x63   : > { %p406_p7 = scmp.lt.s32.totalorder %s1885_s13, 5  ;;  %vm475_vm0 = vcmask 261120   ;;  %v1815_v0 = vmov 0.0|0.0   ;;  %v448_v1 = vld [vmem:[#allocation6 + $0x8] sm:$0xff]  ;;  %v429_v8 = vld [vmem:[%s2013_s28] sm:$0xff]  ;;  %v431_v14 = vld [vmem:[%s2013_s28 + $0x10] sm:$0xff] }
  0x64   : > { %1546 = vmatprep.subr.bf16.mxu0 %v1815_v0  ;;  %1401 = vmatprep.mubr.msk.f32.mxu0 %vm475_vm0, %v448_v1  ;;  %v430_v9 = vld [vmem:[%s2013_s28 + $0x8] sm:$0xff]  ;;  %v653_v10 = vld [vmem:[%s2183_s4] sm:$0xff]  ;;  %v432_v15 = vld [vmem:[%s2013_s28 + $0x18] sm:$0xff]  ;;  %v439_v23 = vmul.f32 %v429_v8, %v429_v8  ;;  %v441_v26 = vmul.f32 %v431_v14, %v431_v14  ;;  %vm1012_vm1 = vcmask 523264   ;;  %vm861_vm2 = vcmask 1043456   ;;  %s1400_s18 = sld [smem:[#allocation2 + $0x1]] }
  0x65   : > { %s2210_s13 = smov (!%p406_p7, %s1885_s13), 5  ;;  %v654_v11 = vld [vmem:[%s2183_s4 + $0x8] sm:$0xff]  ;;  %v2046_v12 = vpack.c.bf16 %v430_v9, %v429_v8  ;;  %v2051_v16 = vpack.c.bf16 %v432_v15, %v431_v14  ;;  %v440_v24 = vmul.f32 %v430_v9, %v430_v9  ;;  %v442_v27 = vmul.f32 %v432_v15, %v432_v15  ;;  %v447_v35 = vld [vmem:[#allocation6] sm:$0xff]  ;;  %v450_v36 = vld [vmem:[#allocation6 + $0x18] sm:$0xff]  ;;  %s433_s21 = sld [smem:[#allocation2]] }
  0x66   : > { %s1440_s17 = sshll.u32 %s2210_s13, 5  ;;  %v1576_v13 = vpack.c.bf16 %v654_v11, %v653_v10  ;;  %v449_v37 = vld [vmem:[#allocation6 + $0x10] sm:$0xff]  ;;  %v452_v38 = vld [vmem:[#allocation6 + $0x28] sm:$0xff]  ;;  %v451_v39 = vld [vmem:[#allocation6 + $0x20] sm:$0xff]  ;;  %vm844_vm3 = vcmask 1041408   ;;  %vm973_vm4 = vcmask 179200  }
  0x67   : > { %s410_s27 = scalar_lea.vmem %s2180_s1, %s1440_s17  ;;  %v1565_v25 = vpack.c.bf16 %v440_v24, %v439_v23  ;;  %v1568_v28 = vpack.c.bf16 %v442_v27, %v441_v26  ;;  %v454_v40 = vld [vmem:[#allocation6 + $0x38] sm:$0xff]  ;;  %v453_v41 = vld [vmem:[#allocation6 + $0x30] sm:$0xff]  ;;  %v456_v42 = vld [vmem:[#allocation6 + $0x48] sm:$0xff]  ;;  %vm977_vm5 = vcmask 177152   ;;  %s1441_s22 = sshll.u32 %s2210_s13, 4  ;;  %vm1211_vm6 = vcmask 130048  }
  0x68   : > { %v425_v2 = vld [vmem:[%s410_s27] sm:$0xff]  ;;  %v426_v3 = vld [vmem:[%s410_s27 + $0x8] sm:$0xff]  ;;  %v427_v4 = vld [vmem:[%s410_s27 + $0x10] sm:$0xff]  ;;  %1577 = vmatprep.subr.bf16.mxu1 %v1576_v13  ;;  %s419_s12 = scalar_lea.vmem %s2187_s8, %s1441_s22  ;;  %s424_s17 = scalar_lea.vmem %s2188_s9, %s1441_s22  ;;  %vm1005_vm7 = vcmask 1040384  }
  0x69   : > { %v2032_v5 = vpack.c.bf16 %v426_v3, %v425_v2  ;;  %v428_v6 = vld [vmem:[%s410_s27 + $0x18] sm:$0xff]  ;;  %1579 = vmatpush3.bf16.msra.mxu1 %v1576_v13  ;;  %v435_v17 = vmul.f32 %v425_v2, %v425_v2  ;;  %v436_v18 = vmul.f32 %v426_v3, %v426_v3  ;;  %v437_v20 = vmul.f32 %v427_v4, %v427_v4  ;;  %v455_v43 = vld [vmem:[#allocation6 + $0x40] sm:$0xff]  ;;  %v457_v45 = vld [vmem:[#allocation6 + $0x50] sm:$0xff]  ;;  %s1395_s19 = sshll.u32 %s2210_s13, 1 }
  0x6a   : > { %v2035_v7 = vpack.c.bf16 %v428_v6, %v427_v4  ;;  %v438_v21 = vmul.f32 %v428_v6, %v428_v6  ;;  %v443_v29 = vmul.f32 %v429_v8, %v425_v2  ;;  %v444_v30 = vmul.f32 %v430_v9, %v426_v3  ;;  %v458_v44 = vld [vmem:[#allocation6 + $0x58] sm:$0xff]  ;;  %v460_v46 = vld [vmem:[#allocation6 + $0x68] sm:$0xff]  ;;  %v459_v47 = vld [vmem:[#allocation6 + $0x60] sm:$0xff]  ;;  %s414_s24 = scalar_lea.vmem %s2186_s7, %s1395_s19 }
  0x6b   : > { %1548 = vmatpush1.bf16.msra.mxu0 %v2032_v5  ;;  %v1559_v19 = vpack.c.bf16 %v436_v18, %v435_v17  ;;  %v445_v32 = vmul.f32 %v431_v14, %v427_v4  ;;  %v446_v33 = vmul.f32 %v432_v15, %v428_v6  ;;  %v462_v48 = vld [vmem:[#allocation6 + $0x78] sm:$0xff]  ;;  %v461_v49 = vld [vmem:[#allocation6 + $0x70] sm:$0xff]  ;;  %v464_v50 = vld [vmem:[#allocation6 + $0x88] sm:$0xff] }
  0x6c   : > { %1549 = vmatprep.subr.bf16.mxu0 %v1815_v0  ;;  %v1562_v22 = vpack.c.bf16 %v438_v21, %v437_v20  ;;  %v1571_v31 = vpack.c.bf16 %v444_v30, %v443_v29  ;;  %v463_v51 = vld [vmem:[#allocation6 + $0x80] sm:$0xff]  ;;  %v466_v52 = vld [vmem:[#allocation6 + $0x98] sm:$0xff]  ;;  %v465_v53 = vld [vmem:[#allocation6 + $0x90] sm:$0xff] }
  0x6d   : > { %v1574_v34 = vpack.c.bf16 %v446_v33, %v445_v32  ;;  %v468_v54 = vld [vmem:[#allocation6 + $0xa8] sm:$0xff]  ;;  %v467_v55 = vld [vmem:[#allocation6 + $0xa0] sm:$0xff]  ;;  %v470_v56 = vld [vmem:[#allocation6 + $0xb8] sm:$0xff] }
  0x6e   : > { %v469_v57 = vld [vmem:[#allocation6 + $0xb0] sm:$0xff]  ;;  %v472_v58 = vld [vmem:[#allocation6 + $0xc8] sm:$0xff]  ;;  %v471_v59 = vld [vmem:[#allocation6 + $0xc0] sm:$0xff] }
  0x6f   : > { %1551 = vmatpush1.bf16.msra.mxu0 %v2035_v7  ;;  %v474_v60 = vld [vmem:[#allocation6 + $0xd8] sm:$0x3f]  ;;  %v473_v61 = vld [vmem:[#allocation6 + $0xd0] sm:$0x3f]  ;;  %v1008_v27 = vld [vmem:[%s2184_s5] sm:$0xff] }
  0x70   : > { %1552 = vmatprep.subr.bf16.mxu0 %v1815_v0  ;;  %v655_v62 = vld [vmem:[%s2183_s4 + $0x10] sm:$0xff]  ;;  %v656_v63 = vld [vmem:[%s2183_s4 + $0x18] sm:$0xff]  ;;  %v1009_v30 = vld [vmem:[%s2184_s5 + $0x8] sm:$0xff] }
  0x71   : > { %v1011_v32 = vld [vmem:[%s2184_s5 + $0x18] sm:$0xff]  ;;  %v1110_v33 = vld [vmem:[%s2185_s6] sm:$0xff] }
  0x73   : > { %1554 = vmatpush1.bf16.msra.mxu0 %v2046_v12 }
  0x74   : > { %1555 = vmatprep.subr.bf16.mxu0 %v1815_v0 }
  0x77   : > { %1557 = vmatpush1.bf16.msra.mxu0 %v2051_v16 }
  0x78   : > { %1558 = vmatprep.subr.bf16.mxu0 %v1815_v0 }
  0x7b   : > { %1560 = vmatpush1.bf16.msra.mxu0 %v1559_v19 }
  0x7c   : > { %1561 = vmatprep.subr.bf16.mxu0 %v1815_v0 }
  0x7f   : > { %1563 = vmatpush1.bf16.msra.mxu0 %v1562_v22 }
  0x80   : > { %1564 = vmatprep.subr.bf16.mxu0 %v1815_v0 }
  0x83   : > { %1566 = vmatpush1.bf16.msra.mxu0 %v1565_v25 }
  0x84   : > { %1567 = vmatprep.subr.bf16.mxu0 %v1815_v0 }
  0x87   : > { %1569 = vmatpush1.bf16.msra.mxu0 %v1568_v28 }
  0x88   : > { %1570 = vmatprep.subr.bf16.mxu0 %v1815_v0 }
  0x8b   : > { %1572 = vmatpush1.bf16.msra.mxu0 %v1571_v31  ;;  %v1010_v31 = vld [vmem:[%s2184_s5 + $0x10] sm:$0xff] }
  0x8c   : > { %1573 = vmatprep.subr.bf16.mxu0 %v1815_v0  ;;  %v1580_v0 = vpack.c.bf16 %v656_v63, %v655_v62 }
  0x8e   : > { %1581 = vmatprep.subr.bf16.mxu1 %v1580_v0 }
  0x8f   : > { %1575 = vmatpush1.bf16.msra.mxu0 %v1574_v34  ;;  %1583 = vmatpush3.bf16.msra.mxu1 %v1580_v0  ;;  %v1111_v34 = vld [vmem:[%s2185_s6 + $0x8] sm:$0xff] }
  0x90   : > { %1585 = vmatprep.subr.bf16.mxu1 %v2032_v5 }
  0x92   : > { %583 = vmatmul.mubr.f32.vlgmr.msra.gmra.mrb[0].mxu0 %v447_v35  ;;  %v1600_v35 = vpack.c.bf16 %v1111_v34, %v1110_v33 }
  0x93   : > { %1402 = vmatprep.mubr.msk.f32.mxu0 %vm475_vm0, %v450_v36  ;;  %v1112_v36 = vld [vmem:[%s2185_s6 + $0x10] sm:$0xff] }
  0x96   : > { %588 = vmatmul.mubr.f32.gmra.mrb[2].mxu0 %v449_v37  ;;  %v1113_v37 = vld [vmem:[%s2185_s6 + $0x18] sm:$0xff] }
  0x97   : > { %1403 = vmatprep.mubr.msk.f32.mxu0 %vm475_vm0, %v452_v38  ;;  %v1604_v38 = vpack.c.bf16 %v1113_v37, %v1112_v36 }
  0x9a   : > { %593 = vmatmul.mubr.f32.gmra.mrb[4].mxu0 %v451_v39 }
  0x9b   : > { %1404 = vmatprep.mubr.msk.f32.mxu0 %vm475_vm0, %v454_v40 }
  0x9e   : > { %598 = vmatmul.mubr.f32.gmra.mrb[6].mxu0 %v453_v41 }
  0x9f   : > { %1405 = vmatprep.mubr.msk.f32.mxu0 %vm475_vm0, %v456_v42 }
  0xa2   : > { %603 = vmatmul.mubr.f32.gmra.mrb[8].mxu0 %v455_v43 }
  0xa3   : > { %1406 = vmatprep.mubr.msk.f32.mxu0 %vm475_vm0, %v458_v44 }
  0xa6   : > { %608 = vmatmul.mubr.f32.gmra.mrb[10].mxu0 %v457_v45 }
  0xa7   : > { %1407 = vmatprep.mubr.msk.f32.mxu0 %vm475_vm0, %v460_v46 }
  0xaa   : > { %613 = vmatmul.mubr.f32.gmra.mrb[12].mxu0 %v459_v47 }
  0xab   : > { %1408 = vmatprep.mubr.msk.f32.mxu0 %vm475_vm0, %v462_v48 }
  0xae   : > { %618 = vmatmul.mubr.f32.gmra.mrb[14].mxu0 %v461_v49 }
  0xaf   : > { %1409 = vmatprep.mubr.msk.f32.mxu0 %vm475_vm0, %v464_v50 }
  0xb2   : > { %623 = vmatmul.mubr.f32.gmra.mrb[16].mxu0 %v463_v51 }
  0xb3   : > { %1410 = vmatprep.mubr.msk.f32.mxu0 %vm475_vm0, %v466_v52 }
  0xb6   : > { %628 = vmatmul.mubr.f32.gmra.mrb[18].mxu0 %v465_v53 }
  0xb7   : > { %1411 = vmatprep.mubr.msk.f32.mxu0 %vm475_vm0, %v468_v54 }
  0xba   : > { %633 = vmatmul.mubr.f32.gmra.mrb[20].mxu0 %v467_v55 }
  0xbb   : > { %1412 = vmatprep.mubr.msk.f32.mxu0 %vm475_vm0, %v470_v56 }
  0xbe   : > { %638 = vmatmul.mubr.f32.gmra.mrb[22].mxu0 %v469_v57 }
  0xbf   : > { %1413 = vmatprep.mubr.msk.f32.mxu0 %vm475_vm0, %v472_v58 }
  0xc2   : > { %643 = vmatmul.mubr.f32.gmra.mrb[24].mxu0 %v471_v59 }
  0xc3   : > { %1414 = vmatprep.mubr.msk.f32.mxu0 %vm475_vm0, %v474_v60 }
  0xc6   : > { %648 = vmatmul.mubr.f32.gmra.mrb[26].mxu0 %v473_v61 }
 0x165   : > { %v584_v1 = vpop.f32.mrb[0].mxu0 }
 0x166   : > { %v586_v2 = vpop.f32.mrb[1].mxu0  ;;  %1489 = vmatprep.mubr.msk.f32.mxu1 %vm475_vm0, %v584_v1 }
 0x169   : > { %v589_v3 = vpop.f32.mrb[2].mxu0 }
 0x16a   : > { %v591_v4 = vpop.f32.mrb[3].mxu0  ;;  %1490 = vmatmul.mubr.msk.f32.vlgmr.msra.gmra.mrb[0].mxu1 %vm475_vm0, %v589_v3 }
 0x16b   : > { %1587 = vmatpush3.bf16.msra.mxu1 %v2032_v5 }
 0x16c   : > { %1589 = vmatprep.subr.bf16.mxu1 %v2035_v7 }
 0x16d   : > { %v594_v6 = vpop.f32.mrb[4].mxu0 }
 0x16e   : > { %v596_v8 = vpop.f32.mrb[5].mxu0  ;;  %1492 = vmatprep.mubr.msk.f32.mxu1 %vm475_vm0, %v594_v6 }
 0x16f   : > { %1591 = vmatpush3.bf16.msra.mxu1 %v2035_v7 }
 0x170   : > { %1593 = vmatprep.subr.bf16.mxu1 %v2046_v12 }
 0x171   : > { %v599_v9 = vpop.f32.mrb[6].mxu0 }
 0x172   : > { %v601_v10 = vpop.f32.mrb[7].mxu0  ;;  %1493 = vmatmul.mubr.msk.f32.gmra.mrb[2].mxu1 %vm475_vm0, %v599_v9 }
 0x173   : > { %1595 = vmatpush3.bf16.msra.mxu1 %v2046_v12 }
 0x174   : > { %1597 = vmatprep.subr.bf16.mxu1 %v2051_v16 }
 0x175   : > { %v604_v11 = vpop.f32.mrb[8].mxu0 }
 0x176   : > { %v606_v5 = vpop.f32.mrb[9].mxu0  ;;  %1495 = vmatprep.mubr.msk.f32.mxu1 %vm475_vm0, %v604_v11 }
 0x177   : > { %1599 = vmatpush3.bf16.msra.mxu1 %v2051_v16 }
 0x178   : > { %1601 = vmatprep.subr.bf16.mxu1 %v1600_v35 }
 0x179   : > { %v609_v13 = vpop.f32.mrb[10].mxu0 }
 0x17a   : > { %v611_v14 = vpop.f32.mrb[11].mxu0  ;;  %1496 = vmatmul.mubr.msk.f32.gmra.mrb[4].mxu1 %vm475_vm0, %v609_v13 }
 0x17d   : > { %v614_v7 = vpop.f32.mrb[12].mxu0 }
 0x17e   : > { %v616_v15 = vpop.f32.mrb[13].mxu0  ;;  %1498 = vmatprep.mubr.msk.f32.mxu1 %vm475_vm0, %v614_v7 }
 0x181   : > { %v619_v17 = vpop.f32.mrb[14].mxu0 }
 0x182   : > { %v621_v18 = vpop.f32.mrb[15].mxu0  ;;  %1499 = vmatmul.mubr.msk.f32.gmra.mrb[6].mxu1 %vm475_vm0, %v619_v17 }
 0x185   : > { %v624_v12 = vpop.f32.mrb[16].mxu0 }
 0x186   : > { %v626_v19 = vpop.f32.mrb[17].mxu0  ;;  %1501 = vmatprep.mubr.msk.f32.mxu1 %vm475_vm0, %v624_v12 }
 0x189   : > { %v629_v20 = vpop.f32.mrb[18].mxu0 }
 0x18a   : > { %v631_v21 = vpop.f32.mrb[19].mxu0  ;;  %1502 = vmatmul.mubr.msk.f32.gmra.mrb[8].mxu1 %vm475_vm0, %v629_v20 }
 0x18d   : > { %v634_v16 = vpop.f32.mrb[20].mxu0 }
 0x18e   : > { %v636_v22 = vpop.f32.mrb[21].mxu0  ;;  %1504 = vmatprep.mubr.msk.f32.mxu1 %vm475_vm0, %v634_v16 }
 0x191   : > { %v639_v23 = vpop.f32.mrb[22].mxu0 }
 0x192   : > { %v641_v24 = vpop.f32.mrb[23].mxu0  ;;  %1505 = vmatmul.mubr.msk.f32.gmra.mrb[10].mxu1 %vm475_vm0, %v639_v23 }
 0x195   : > { %v644_v25 = vpop.f32.mrb[24].mxu0 }
 0x196   : > { %v646_v26 = vpop.f32.mrb[25].mxu0  ;;  %1507 = vmatprep.mubr.msk.f32.mxu1 %vm475_vm0, %v644_v25 }
 0x199   : > { %v649_v28 = vpop.f32.mrb[26].mxu0 }
 0x19a   : > { %1508 = vmatmul.mubr.msk.f32.gmra.mrb[12].mxu1 %vm475_vm0, %v649_v28  ;;  %v651_v29 = vpop.f32.mrb[27].mxu0 }
 0x19b   : > { %1526 = vmatprep.mubr.msk.f32.mxu1 %vm1012_vm1, %v1008_v27 }
 0x19e   : > { %1527 = vmatmul.mubr.msk.f32.vlgmr.msra.gmra.mrb[14].mxu1 %vm1012_vm1, %v1009_v30  ;;  %v896_v30 = vstv %s1400_s18 }
 0x19f   : > { %1529 = vmatprep.mubr.msk.f32.mxu1 %vm1012_vm1, %v1010_v31  ;;  %1603 = vmatpush3.bf16.msra.mxu1 %v1600_v35 }
 0x1a0   : > { %1605 = vmatprep.subr.bf16.mxu1 %v1604_v38 }
 0x1a2   : > { %1530 = vmatmul.mubr.msk.f32.gmra.mrb[16].mxu1 %vm1012_vm1, %v1011_v32 }
 0x1a3   : > { %1607 = vmatpush3.bf16.msra.mxu1 %v1604_v38 }
 0x23d   : > { %v1491_v39 = vpop.f32.mrb[0].mxu1 }
 0x23e   : > { %v835_v40 = vmul.f32 %v1491_v39, %v1491_v39  ;;  %v765_v41 = vpop.f32.mrb[1].mxu1 }
 0x23f   : > { %v834_v42 = vmul.f32 %v765_v41, %v765_v41 }
 0x240   : > { %v863_v43 = vrot.slane %v835_v40, 4 }
 0x241   : > { %v862_v44 = vrot.slane %v834_v42, 4 }
 0x243   : > { %v864_v45 = vsel %vm861_vm2, %v862_v44, %v863_v43 }
 0x245   : > { %v1494_v46 = vpop.f32.mrb[2].mxu1 }
 0x246   : > { %v837_v47 = vmul.f32 %v1494_v46, %v1494_v46  ;;  %v846_v48 = vrot.slane %v1494_v46, 6  ;;  %v775_v49 = vpop.f32.mrb[3].mxu1 }
 0x247   : > { %v836_v50 = vmul.f32 %v775_v49, %v775_v49  ;;  %v845_v51 = vrot.slane %v775_v49, 6 }
 0x248   : > { %v878_v52 = vrot.slane %v837_v47, 4  ;;  %v952_v53 = vrot.slane %v837_v47, 6 }
 0x249   : > { %v951_v54 = vrot.slane %v836_v50, 6  ;;  %v865_v55 = vrot.slane %v836_v50, 4  ;;  %v847_v56 = vsel %vm844_vm3, %v845_v51, %v846_v48 }
 0x24a   : > { %v2121_v57 = vmul.f32 %v847_v56, %v765_v41 }
 0x24b   : > { %v953_v58 = vsel %vm844_vm3, %v951_v54, %v952_v53  ;;  %v866_v59 = vsel %vm861_vm2, %v863_v43, %v865_v55  ;;  %v879_v60 = vsel %vm861_vm2, %v865_v55, %v878_v52 }
 0x24c   : > { %v961_v61 = vadd.f32 %v953_v58, %v834_v42 }
 0x24d   : > { %v1497_v62 = vpop.f32.mrb[4].mxu1 }
 0x24e   : > { %v839_v63 = vmul.f32 %v1497_v62, %v1497_v62  ;;  %v850_v0 = vrot.slane %v1497_v62, 6  ;;  %v871_v1 = vsub.f32 %v1497_v62, %v862_v44  ;;  %v785_v2 = vpop.f32.mrb[5].mxu1 }
 0x24f   : > { %v838_v3 = vmul.f32 %v785_v2, %v785_v2  ;;  %v848_v4 = vrot.slane %v785_v2, 6 }
 0x250   : > { %v882_v6 = vrot.slane %v839_v63, 4  ;;  %v956_v8 = vrot.slane %v839_v63, 6 }
 0x251   : > { %v880_v9 = vrot.slane %v838_v3, 4  ;;  %v954_v10 = vrot.slane %v838_v3, 6  ;;  %v851_v11 = vsel %vm844_vm3, %v848_v4, %v850_v0  ;;  %v849_v5 = vsel %vm844_vm3, %v846_v48, %v848_v4 }
 0x252   : > { %v2128_v13 = vmul.f32 %v851_v11, %v775_v49  ;;  %v2130_v14 = vmul.f32 %v1491_v39, %v849_v5  ;;  %v944_v39 = vstv %s433_s21 }
 0x253   : > { %v955_v7 = vsel %vm844_vm3, %v952_v53, %v954_v10  ;;  %v957_v15 = vsel %vm844_vm3, %v954_v10, %v956_v8  ;;  %v881_v17 = vsel %vm861_vm2, %v878_v52, %v880_v9  ;;  %v883_v18 = vsel %vm861_vm2, %v880_v9, %v882_v6 }
 0x254   : > { %v962_v12 = vadd.f32 %v955_v7, %v835_v40  ;;  %v963_v19 = vadd.f32 %v957_v15, %v836_v50  ;;  %v964_v42 = vadd.f32 %v961_v61, %v944_v39  ;;  %v943_v7 = vmul.f32 2.0, %v2128_v13 }
 0x255   : > { %v1500_v20 = vpop.f32.mrb[6].mxu1  ;;  %v942_v15 = vmul.f32 2.0, %v2130_v14 }
 0x256   : > { %v873_v21 = vsub.f32 %v1500_v20, %v866_v59  ;;  %v795_v16 = vpop.f32.mrb[7].mxu1  ;;  %v965_v56 = vadd.f32 %v962_v12, %v944_v39  ;;  %v941_v59 = vmul.f32 2.0, %v2121_v57  ;;  %v966_v61 = vadd.f32 %v963_v19, %v944_v39 }
 0x257   : > { %v872_v22 = vsub.f32 %v795_v16, %v864_v45 }
 0x258   : > { %v945_v3 = vadd.f32 %v944_v39, %v941_v59 }
 0x25d   : > { %v1503_v23 = vpop.f32.mrb[8].mxu1 }
 0x25e   : > { %v888_v24 = vsub.f32 %v1503_v23, %v881_v17  ;;  %v805_v25 = vpop.f32.mrb[9].mxu1 }
 0x25f   : > { %v874_v26 = vsub.f32 %v805_v25, %v865_v55  ;;  %v887_v27 = vsub.f32 %v805_v25, %v879_v60 }
 0x260   : > { %v904_v28 = vrot.slane %v888_v24, 6  ;;  %v946_v24 = vadd.f32 %v944_v39, %v942_v15 }
 0x261   : > { %v903_v29 = vrot.slane %v887_v27, 6 }
 0x263   : > { %v905_v31 = vsel %vm844_vm3, %v903_v29, %v904_v28  ;;  %v912_v32 = vadd.f32 %v903_v29, %v871_v1 }
 0x264   : > { %v913_v33 = vadd.f32 %v905_v31, %v872_v22  ;;  %v947_v22 = vadd.f32 %v944_v39, %v943_v7 }
 0x265   : > { %v916_v34 = vadd.f32 %v912_v32, %v896_v30  ;;  %v1506_v35 = vpop.f32.mrb[10].mxu1 }
 0x266   : > { %v917_v36 = vadd.f32 %v913_v33, %v896_v30  ;;  %v890_v37 = vsub.f32 %v1506_v35, %v2121_v57  ;;  %v815_v38 = vpop.f32.mrb[11].mxu1 }
 0x267   : > { %1677 = vrcp.f32 %v916_v34  ;;  %v889_v40 = vsub.f32 %v815_v38, %v883_v18 }
 0x268   : > { %1679 = vrcp.f32 %v917_v36  ;;  %v893_v52 = vmul.f32 2.0, %v890_v37 }
 0x269   : > { %v906_v41 = vrot.slane %v889_v40, 6  ;;  %1681 = vrcp.f32 %v964_v42 }
 0x26a   : > { %v897_v63 = vadd.f32 %v896_v30, %v893_v52 }
 0x26b   : > { %v907_v43 = vsel %vm844_vm3, %v904_v28, %v906_v41  ;;  %v915_v44 = vadd.f32 %v906_v41, %v874_v26 }
 0x26c   : > { %v914_v45 = vadd.f32 %v907_v43, %v873_v21 }
 0x26d   : > { %v919_v46 = vadd.f32 %v915_v44, %v896_v30  ;;  %v1509_v47 = vpop.f32.mrb[12].mxu1 }
 0x26e   : > { %v918_v48 = vadd.f32 %v914_v45, %v896_v30  ;;  %v892_v49 = vsub.f32 %v1509_v47, %v2128_v13  ;;  %v825_v50 = vpop.f32.mrb[13].mxu1 }
 0x26f   : > { %1683 = vrcp.f32 %v919_v46  ;;  %v891_v51 = vsub.f32 %v825_v50, %v2130_v14 }
 0x270   : > { %1685 = vrcp.f32 %v918_v48  ;;  %v895_v57 = vmul.f32 2.0, %v892_v49 }
 0x271   : > { %v1678_v53 = vpop.eup %1677  ;;  %v1528_v54 = vpop.f32.mrb[14].mxu1  ;;  %1687 = vrcp.f32 %v965_v56  ;;  %v894_v8 = vmul.f32 2.0, %v891_v51 }
 0x272   : > { %v1680_v55 = vpop.eup %1679  ;;  %v928_v58 = vrot.slane %v1678_v53, 4  ;;  %v1091_v60 = vpop.f32.mrb[15].mxu1  ;;  %1689 = vrcp.f32 %v966_v61  ;;  %v899_v12 = vadd.f32 %v896_v30, %v895_v57 }
 0x273   : > { %v929_v62 = vrot.slane %v1680_v55, 4  ;;  %1540 = vmatprep.mubr.msk.f32.mxu1 %vm475_vm0, %v1091_v60  ;;  %v1682_v6 = vpop.eup %1681  ;;  %v898_v19 = vadd.f32 %v896_v30, %v894_v8 }
 0x274   : > { %1541 = vmatmul.mubr.msk.f32.vlgmr.msra.gmra.mrb[18].mxu1 %vm475_vm0, %v1528_v54 }
 0x275   : > { %v930_v0 = vsel %vm861_vm2, %v928_v58, %v929_v62  ;;  %v1531_v1 = vpop.f32.mrb[16].mxu1 }
 0x276   : > { %v938_v2 = vmul.f32 %v930_v0, %v897_v63  ;;  %v1101_v4 = vpop.f32.mrb[17].mxu1 }
 0x277   : > { %1543 = vmatprep.mubr.msk.f32.mxu1 %vm475_vm0, %v1101_v4 }
 0x278   : > { %1544 = vmatmul.mubr.msk.f32.gmra.mrb[20].mxu1 %vm475_vm0, %v1531_v1  ;;  %v948_v9 = vmul.f32 %v945_v3, %v938_v2  ;;  %v989_v13 = vsel %vm973_vm4, %v938_v2, 0.0 }
 0x279   : > { %v1684_v10 = vpop.eup %1683 }
 0x27a   : > { %v1686_v11 = vpop.eup %1685  ;;  %v933_v5 = vrot.slane %v1684_v10, 4  ;;  %v970_v17 = vmul.f32 %v1682_v6, %v948_v9 }
 0x27b   : > { %v931_v18 = vrot.slane %v1686_v11, 4  ;;  %v1688_v25 = vpop.eup %1687 }
 0x27c   : > { %v1690_v28 = vpop.eup %1689  ;;  %v974_v34 = vsel %vm973_vm4, %v970_v17, 0.0 }
 0x27d   : > { %v934_v20 = vsel %vm861_vm2, %v931_v18, %v933_v5  ;;  %v932_v21 = vsel %vm861_vm2, %v929_v62, %v931_v18 }
 0x27e   : > { %v940_v16 = vmul.f32 %v934_v20, %v899_v12  ;;  %v939_v23 = vmul.f32 %v932_v21, %v898_v19 }
 0x280   : > { %v949_v26 = vmul.f32 %v946_v24, %v939_v23  ;;  %v950_v27 = vmul.f32 %v947_v22, %v940_v16  ;;  %v990_v14 = vsel %vm973_vm4, %v939_v23, 0.0  ;;  %v992_v32 = vsel %vm977_vm5, %v940_v16, 0.0 }
 0x281   : > { %v991_v29 = vadd.f32 %v990_v14, %v989_v13 }
 0x282   : > { %v971_v30 = vmul.f32 %v1688_v25, %v949_v26  ;;  %v972_v31 = vmul.f32 %v1690_v28, %v950_v27 }
 0x283   : > { %v993_v33 = vadd.f32 %v992_v32, %v991_v29 }
 0x284   : > { %v975_v35 = vsel %vm973_vm4, %v971_v30, 0.0  ;;  %v978_v37 = vsel %vm977_vm5, %v972_v31, 0.0 }
 0x285   : > { %v976_v36 = vadd.f32 %v975_v35, %v974_v34 }
 0x287   : > { %v979_v38 = vadd.f32 %v978_v37, %v976_v36 }
 0x289   : > { %980 = vadd.xlane.f32.xlu0 %v979_v38 }
 0x28d   : > { %994 = vadd.xlane.f32.xlu0 %v993_v33 }
 0x316   : > { %v981_v39 = vpop.xlane.xlu0 %980 }
 0x317   : > { %v982_v40 = vrot.slane %v981_v39, 4 }
 0x319   : > { %v983_v41 = vadd.f32 %v982_v40, %v981_v39 }
 0x31a   : > { %v995_v42 = vpop.xlane.xlu0 %994 }
 0x31b   : > { %v984_v43 = vrot.slane %v983_v41, 2  ;;  %v996_v44 = vrot.slane %v995_v42, 4 }
 0x31d   : > { %v997_v45 = vadd.f32 %v996_v44, %v995_v42  ;;  %v985_v46 = vadd.f32 %v984_v43, %v983_v41 }
 0x31f   : > { %v998_v47 = vrot.slane %v997_v45, 2  ;;  %v986_v48 = vrot.slane %v985_v46, 1 }
 0x321   : > { %v999_v49 = vadd.f32 %v998_v47, %v997_v45  ;;  %v987_v50 = vadd.f32 %v986_v48, %v985_v46 }
 0x323   : > { %1608 = vpush %v987_v50  ;;  %v1000_v51 = vrot.slane %v999_v49, 1 }
 0x325   : > { %v1001_v52 = vadd.f32 %v1000_v51, %v999_v49 }
 0x327   : > { %1610 = vpush %v1001_v52 }
 0x347   : > { %v1542_v53 = vpop.f32.mrb[18].mxu1 }
 0x348   : > { %1213 = vst.msk [vmem:[%s419_s12 + $0x8] sm:$0xff] %vm1211_vm6, %v1542_v53  ;;  %v1192_v54 = vpop.f32.mrb[19].mxu1 }
 0x349   : > { %1212 = vst.msk [vmem:[%s419_s12] sm:$0xff] %vm1211_vm6, %v1192_v54 }
 0x34b   : > { %v1545_v55 = vpop.f32.mrb[20].mxu1 }
 0x34c   : > { %1215 = vst.msk [vmem:[%s424_s17 + $0x8] sm:$0xff] %vm1211_vm6, %v1545_v55  ;;  %v1202_v56 = vpop.f32.mrb[21].mxu1 }
 0x34d   : > { %1214 = vst.msk [vmem:[%s424_s17] sm:$0xff] %vm1211_vm6, %v1202_v56 }
 0x354   : > { %s1609_s20 = spop %1608 }
 0x355   : > { %v1003_v58 = vstv %s1609_s20 }
 0x358   : > { %s1611_s29 = spop %1610 }
 0x359   : > { %v1004_v59 = vstv %s1611_s29 }
 0x35a   : > { %v1006_v60 = vsel %vm1005_vm7, %v1003_v58, %v1004_v59 }
 0x35b   : > { %1007 = vst [vmem:[%s414_s24] sm:$0x3] %v1006_v60 }
 0x35c PF: > { %s2204_s15 = sld [smem:[#allocation11_spill]]  ;;  %p22_p10 = scmp.ge.s32.totalorder %s1888_s14, 8  }
 0x35d   : > { %s2205_s30 = smov %s1798_s10  ;;  %s2206_s10 = smov %s1802_s11 }
 0x35e   : > { %s2208_s12 = smov %s1888_s14  ;;  %24 = sbr.rel (!%p22_p10) target bundleno = 7 (0x7), region = 124 }
 0x362   : > { %s2207_s11 = smov %s2204_s15 }
 0x365   :  { %1267 = vsyncpa [#allocation3], 1 }
 0x366   :  { %1269 = vsyncpa [#allocation3 + $0x1], 1 }
 0x367   :  { %1270 = vsyncpa [#allocation7], 1 }
 0x368   :  { %1271 = vsyncpa [#allocation4], 1 }
 0x369   :  { %1273 = vsyncpa [#allocation4 + $0x1], 1 }

// kernel: msssim.7
= control target key start
LH: loop header
LB: loop body
LE: loop exit
PB: predicated region body
PF: predicated region fallthrough
CT: control target
= control target key end

     0   :  { %15 = vsyncpa [#allocation3], 0  ;;  %s1062_s30 = smov 0   ;;  %s1133_s0 = inlined_call_operand.vmem [shape: f32[2], index: 0, kind: input, shape index: {}]   ;;  %s1134_s1 = inlined_call_operand.vmem [shape: f32[6,8,8], index: 1, kind: input, shape index: {}]   ;;  %s1135_s2 = inlined_call_operand.vmem [shape: f32[6,8,8], index: 2, kind: input, shape index: {}]   ;;  %s1136_s3 = inlined_call_operand.vmem [shape: f32[5,40], index: 3, kind: input, shape index: {}]   ;;  %s1137_s4 = inlined_call_operand.vmem [shape: f32[8,1], index: 4, kind: input, shape index: {}]   ;;  %s1138_s5 = inlined_call_operand.vmem [shape: f32[8,16], index: 5, kind: input, shape index: {}]   ;;  %s1139_s6 = inlined_call_operand.vmem [shape: f32[8,4], index: 6, kind: input, shape index: {}]   ;;  %s1140_s7 = inlined_call_operand.vmem [shape: f32[6,2,128], index: 7, kind: output, shape index: {0}]   ;;  %s1141_s8 = inlined_call_operand.vmem [shape: f32[6,4,4], index: 8, kind: output, shape index: {1}]   ;;  %s1142_s9 = inlined_call_operand.vmem [shape: f32[6,4,4], index: 9, kind: output, shape index: {2}]  }
   0x1 LB: > { %s1068_s10 = sadd.s32 4294967295, %s1006_s30   ;;  %p882_p0 = scmp.ge.s32.totalorder %s1006_s30, 1  ;;  %s1006_s30 = sphi %s1062_s30, %s21_s30  }
   0x2   : > { %p261_p1 = scmp.lt.s32.totalorder %s1006_s30, 7  ;;  %s274_s13 = sshll.u32 %s1133_s0, 4  ;;  %s275_s13 = int_to_ptr.vmem [resolvable:$true] %s274_s13 }
   0x3   : > { %p963_p3 = scmp.eq.s32.totalorder %s1068_s10, 0  ;;  %s981_s15 = scalar_lea.vmem %s275_s13, 16 }
   0x4   : > { %p1075_p2 = pnand %p882_p0, %p261_p1  ;;  %p982_p6 = scmp.ne.s32.totalorder %s275_s13, %s981_s15 }
   0x5   : > { %p989_p10 = scmp.lt.s32.totalorder %s275_s13, %s275_s13  ;;  %p990_p11 = scmp.lt.s32.totalorder %s981_s15, %s981_s15 }
   0x6   : > { %p959_p4 = pneg %p1075_p2 }
   0x7   : > { %p991_p12 = por %p990_p11, %p989_p10 }
   0x8   : > { %p960_p5 = pnand %p963_p3, %p959_p4 }
   0xa   : > { %p983_p7 = pneg %p960_p5 }
   0xc   : > { %p984_p8 = pnand %p983_p7, %p982_p6 }
   0xe   : > { %p985_p9 = pneg %p984_p8 }
  0x10   : > { %p992_p13 = pnand %p991_p12, %p985_p9 }
  0x12   : > { %995 = shalt.err (!%p992_p13)
}
  0x13   : > { %s1008_s16 = smov [#allocation2]   ;;  %313 = sbr.rel (%p1075_p2) target bundleno = 689 (0x2b1), region = 48 }
  0x14   : > { %962 = dma.vmem_to_smem (!%p960_p5), %s275_s13, 16, %s1008_s16, [#allocation3]  }
  0x1a   : > { %1001 = dma.done.wait (%p963_p3), [#allocation3], 16  }
  0x1b   : > { %1003 = vsyncadd (%p963_p3), [#allocation3], 4294967280 }
  0x1c   : > { %319 = sfence }
  0x1d   : > { %p360_p0 = scmp.lt.s32.totalorder %s1068_s10, 5  ;;  %v1009_v0 = vmov 0.0|0.0   ;;  %vm1010_vm0 = vmmov 0   ;;  %v1011_v1 = vmov 0.0   ;;  %v462_v2 = vld [vmem:[%s1137_s4] sm:$0xff]  ;;  %vm388_vm1 = vcmask 326656  }
  0x1e   : > { %942 = vmatprep.subr.bf16.mxu0 %v1009_v0  ;;  %922 = vmatprep.mubr.msk.f32.mxu0 %vm1010_vm0, %v1011_v1  ;;  %v387_v10 = vld [vmem:[%s1136_s3] sm:$0x1f]  ;;  %vm463_vm2 = vcmask 64512   ;;  %vm589_vm3 = vcmask 130048   ;;  %s892_s13 = sld [smem:[#allocation2 + $0x1]]  ;;  %s382_s14 = sld [smem:[#allocation2]] }
  0x1f   : > { %s1145_s10 = smov (!%p360_p0, %s1068_s10), 5  ;;  %925 = vmatprep.subr.mxu1 %v1011_v1  ;;  %927 = vmatprep.mubr.msk.f32.mxu1 %vm1010_vm0, %v1011_v1  ;;  %v588_v13 = vld [vmem:[%s1138_s5] sm:$0xff]  ;;  %vm585_vm4 = vcmask 1040384   ;;  %vm737_vm5 = vcmask 27648   ;;  %vm739_vm6 = vcmask 31748  }
  0x20   : > { %926 = vmatpush3.msra.mxu1 %v462_v2  ;;  %s887_s19 = sshll.u32 %s1145_s10, 3  ;;  %v663_v14 = vld [vmem:[%s1139_s6] sm:$0xff]  ;;  %s889_s15 = sshll.u32 %s1145_s10, 1 }
  0x21   : > { %948 = vmatprep.subr.bf16.mxu1 %v1009_v0  ;;  %s363_s22 = scalar_lea.vmem %s1134_s1, %s887_s19  ;;  %s367_s25 = scalar_lea.vmem %s1135_s2, %s887_s19 }
  0x22   : > { %v380_v3 = vld [vmem:[%s363_s22] sm:$0xff]  ;;  %s371_s19 = scalar_lea.vmem %s1140_s7, %s889_s15  ;;  %s890_s21 = sshll.u32 %s1145_s10, 2 }
  0x23   : > { %v381_v4 = vld [vmem:[%s367_s25] sm:$0xff]  ;;  %v384_v6 = vmul.f32 %v380_v3, %v380_v3  ;;  %s375_s24 = scalar_lea.vmem %s1141_s8, %s890_s21  ;;  %s379_s27 = scalar_lea.vmem %s1142_s9, %s890_s21 }
  0x24   : > { %v943_v5 = vpack.c.bf16 %v381_v4, %v380_v3  ;;  %v385_v7 = vmul.f32 %v381_v4, %v381_v4  ;;  %v386_v9 = vmul.f32 %v381_v4, %v380_v3  ;;  %v551_v25 = vstv %s892_s13 }
  0x25   : > { %v564_v31 = vstv %s382_s14 }
  0x26   : > { %944 = vmatpush3.bf16.msra.mxu0 %v943_v5  ;;  %v946_v8 = vpack.c.bf16 %v385_v7, %v384_v6 }
  0x27   : > { %945 = vmatprep.subr.bf16.mxu0 %v1009_v0 }
  0x2a   : > { %947 = vmatpush3.bf16.msra.mxu0 %v946_v8 }
  0x2b   : > { %920 = vmatprep.subr.mxu0 %v1011_v1 }
  0x2e   : > { %921 = vmatpush3.msra.mxu0 %v386_v9 }
  0x2f   : > { %923 = vmatmul.mubr.msk.f32.vlgmr.msra.gmra.mrb[0].mxu0 %vm388_vm1, %v387_v10 }
 0x102   : > { %v458_v11 = vpop.f32.mrb[0].mxu0 }
 0x103   : > { %v924_v12 = vpop.f32.mrb[1].mxu0  ;;  %928 = vmatmul.mubr.msk.f32.vlgmr.msra.gmra.mrb[0].mxu1 %vm463_vm2, %v458_v11 }
 0x104   : > { %950 = vmatpush3.bf16.msra.mxu1 %v943_v5  ;;  %934 = vmatprep.mubr.msk.f32.mxu1 %vm1010_vm0, %v1011_v1 }
 0x105   : > { %937 = vmatprep.subr.mxu1 %v1011_v1 }
 0x107   : > { %935 = vmatmul.mubr.msk.f32.vlgmr.msra.gmra.mrb[2].mxu1 %vm589_vm3, %v588_v13 }
 0x108   : > { %939 = vmatprep.mubr.msk.f32.mxu1 %vm1010_vm0, %v1011_v1  ;;  %938 = vmatpush3.msra.mxu1 %v663_v14 }
 0x1d6   : > { %v533_v15 = vpop.f32.mrb[0].mxu1 }
 0x1d7   : > { %v537_v16 = vmul.f32 %v533_v15, %v533_v15  ;;  %v929_v17 = vpop.f32.mrb[1].mxu1  ;;  %v539_v19 = vrot.slane %v533_v15, 1 }
 0x1d9   : > { %v543_v18 = vrot.slane %v537_v16, 6  ;;  %v541_v24 = vmul.f32 %v539_v19, %v533_v15  ;;  %v570_v27 = vrot.slane %v537_v16, 1 }
 0x1da   : > { %v659_v20 = vpop.f32.mrb[2].mxu1 }
 0x1db   : > { %v545_v21 = vsub.f32 %v533_v15, %v543_v18  ;;  %v936_v22 = vpop.f32.mrb[3].mxu1  ;;  %940 = vmatmul.mubr.msk.f32.vlgmr.msra.gmra.mrb[4].mxu1 %vm463_vm2, %v659_v20  ;;  %v547_v29 = vrot.slane %v541_v24, 4  ;;  %v572_v30 = vadd.f32 %v570_v27, %v537_v16  ;;  %v563_v38 = vmul.f32 2.0, %v541_v24 }
 0x1dd   : > { %v554_v23 = vrot.slane %v545_v21, 1  ;;  %v549_v32 = vsub.f32 %v533_v15, %v547_v29  ;;  %v573_v33 = vadd.f32 %v572_v30, %v564_v31  ;;  %v565_v40 = vadd.f32 %v564_v31, %v563_v38 }
 0x1df   : > { %v556_v26 = vadd.f32 %v554_v23, %v545_v21  ;;  %v550_v34 = vmul.f32 2.0, %v549_v32 }
 0x1e1   : > { %v557_v28 = vadd.f32 %v556_v26, %v551_v25  ;;  %v552_v36 = vadd.f32 %v551_v25, %v550_v34 }
 0x1e3   : > { %977 = vrcp.f32 %v557_v28 }
 0x1e4   : > { %979 = vrcp.f32 %v573_v33 }
 0x1ed   : > { %v978_v35 = vpop.eup %977 }
 0x1ee   : > { %v560_v37 = vrot.slane %v978_v35, 6  ;;  %v980_v43 = vpop.eup %979 }
 0x1f0   : > { %v562_v39 = vmul.f32 %v560_v37, %v552_v36 }
 0x1f2   : > { %v567_v41 = vrot.slane %v562_v39, 4 }
 0x1f4   : > { %v569_v42 = vmul.f32 %v567_v41, %v565_v40 }
 0x1f6   : > { %v575_v44 = vmul.f32 %v980_v43, %v569_v42 }
 0x1f8   : > { %951 = vpush %v575_v44 }
 0x1f9   : > { %953 = vpush %v567_v41 }
 0x229   : > { %s952_s16 = spop %951 }
 0x22a   : > { %v583_v45 = vstv %s952_s16  ;;  %s954_s20 = spop %953 }
 0x22b   : > { %v584_v46 = vstv %s954_s20 }
 0x22c   : > { %v586_v47 = vsel %vm585_vm4, %v583_v45, %v584_v46 }
 0x22d   : > { %587 = vst [vmem:[%s371_s19] sm:$0x3] %v586_v47 }
 0x2ae   : > { %v733_v48 = vpop.f32.mrb[4].mxu1 }
 0x2af   : > { %738 = vst.msk [vmem:[%s375_s24] sm:$0xf] %vm737_vm5, %v733_v48  ;;  %v941_v49 = vpop.f32.mrb[5].mxu1 }
 0x2b0   : > { %740 = vst.msk [vmem:[%s379_s27 - $0x4] sm:$0xf0] %vm739_vm6, %v733_v48 }
 0x2b1 PF: > { %s21_s30 = sadd.s32 1, %s1006_s30  }
 0x2b2   : > { %p18_p1 = scmp.ge.s32.totalorder %s21_s30, 8  }
 0x2b4   :  { %20 = sbr.rel (!%p18_p1) target bundleno = 1 (0x1), region = 110 }
 0x2bb   :  { %788 = vsyncpa [#allocation3], 1 }
 0x2bc   :  { %790 = vsyncpa [#allocation3 + $0x1], 1 }

// kernel: msssim.6
= control target key start
LH: loop header
LB: loop body
LE: loop exit
PB: predicated region body
PF: predicated region fallthrough
CT: control target
= control target key end

     0   :  { %15 = vsyncpa [#allocation3], 0  ;;  %s1246_s30 = smov 0   ;;  %s1341_s0 = inlined_call_operand.vmem [shape: f32[2], index: 0, kind: input, shape index: {}]   ;;  %s1342_s1 = inlined_call_operand.vmem [shape: f32[6,16,16], index: 1, kind: input, shape index: {}]   ;;  %s1343_s2 = inlined_call_operand.vmem [shape: f32[6,16,16], index: 2, kind: input, shape index: {}]   ;;  %s1344_s3 = inlined_call_operand.vmem [shape: f32[30,80], index: 3, kind: input, shape index: {}]   ;;  %s1345_s4 = inlined_call_operand.vmem [shape: f32[16,6], index: 4, kind: input, shape index: {}]   ;;  %s1346_s5 = inlined_call_operand.vmem [shape: f32[16,32], index: 5, kind: input, shape index: {}]   ;;  %s1347_s6 = inlined_call_operand.vmem [shape: f32[16,8], index: 6, kind: input, shape index: {}]   ;;  %s1348_s7 = inlined_call_operand.vmem [shape: f32[6,2,128], index: 7, kind: output, shape index: {0}]   ;;  %s1349_s8 = inlined_call_operand.vmem [shape: f32[6,8,8], index: 8, kind: output, shape index: {1}]   ;;  %s1350_s9 = inlined_call_operand.vmem [shape: f32[6,8,8], index: 9, kind: output, shape index: {2}]  }
   0x1 LB: > { %s1252_s10 = sadd.s32 4294967295, %s1193_s30   ;;  %p990_p0 = scmp.ge.s32.totalorder %s1193_s30, 1  ;;  %s1193_s30 = sphi %s1246_s30, %s21_s30  }
   0x2   : > { %p261_p1 = scmp.lt.s32.totalorder %s1193_s30, 7  ;;  %s274_s13 = sshll.u32 %s1341_s0, 4  ;;  %s275_s13 = int_to_ptr.vmem [resolvable:$true] %s274_s13 }
   0x3   : > { %p1151_p3 = scmp.eq.s32.totalorder %s1252_s10, 0  ;;  %s1168_s15 = scalar_lea.vmem %s275_s13, 16 }
   0x4   : > { %p1259_p2 = pnand %p990_p0, %p261_p1  ;;  %p1169_p6 = scmp.ne.s32.totalorder %s275_s13, %s1168_s15 }
   0x5   : > { %p1176_p10 = scmp.lt.s32.totalorder %s275_s13, %s275_s13  ;;  %p1177_p11 = scmp.lt.s32.totalorder %s1168_s15, %s1168_s15 }
   0x6   : > { %p1147_p4 = pneg %p1259_p2 }
   0x7   : > { %p1178_p12 = por %p1177_p11, %p1176_p10 }
   0x8   : > { %p1148_p5 = pnand %p1151_p3, %p1147_p4 }
   0xa   : > { %p1170_p7 = pneg %p1148_p5 }
   0xc   : > { %p1171_p8 = pnand %p1170_p7, %p1169_p6 }
   0xe   : > { %p1172_p9 = pneg %p1171_p8 }
  0x10   : > { %p1179_p13 = pnand %p1178_p12, %p1172_p9 }
  0x12   : > { %1182 = shalt.err (!%p1179_p13)
}
  0x13   : > { %s1195_s16 = smov [#allocation2]   ;;  %315 = sbr.rel (%p1259_p2) target bundleno = 730 (0x2da), region = 48 }
  0x14   : > { %1150 = dma.vmem_to_smem (!%p1148_p5), %s275_s13, 16, %s1195_s16, [#allocation3]  }
  0x1a   : > { %1188 = dma.done.wait (%p1151_p3), [#allocation3], 16  }
  0x1b   : > { %1190 = vsyncadd (%p1151_p3), [#allocation3], 4294967280 }
  0x1c   : > { %321 = sfence }
  0x1d   : > { %p364_p0 = scmp.lt.s32.totalorder %s1252_s10, 5  ;;  %v398_v0 = vld [vmem:[%s1344_s3] sm:$0xff]  ;;  %vm402_vm0 = vcmask 654336   ;;  %v501_v2 = vld [vmem:[%s1345_s4 + $0x8] sm:$0xff]  ;;  %v400_v20 = vld [vmem:[%s1344_s3 + $0x10] sm:$0xff]  ;;  %vm502_vm1 = vcmask 130048  }
  0x1e   : > { %1069 = vmatprep.mubr.msk.f32.mxu0 %vm402_vm0, %v398_v0  ;;  %v500_v1 = vld [vmem:[%s1345_s4] sm:$0xff]  ;;  %v399_v19 = vld [vmem:[%s1344_s3 + $0x8] sm:$0xff]  ;;  %v401_v21 = vld [vmem:[%s1344_s3 + $0x18] sm:$0x3f]  ;;  %vm681_vm2 = vcmask 261120   ;;  %vm604_vm3 = vcmask 1041408  }
  0x1f   : > { %s1353_s10 = smov (!%p364_p0, %s1252_s10), 5  ;;  %v1123_v3 = vpack.c.bf16 %v501_v2, %v500_v1  ;;  %v679_v26 = vld [vmem:[%s1346_s5] sm:$0xff]  ;;  %v680_v27 = vld [vmem:[%s1346_s5 + $0x8] sm:$0xff]  ;;  %vm616_vm4 = vcmask 1043456   ;;  %s1002_s25 = sld [smem:[#allocation2 + $0x1]]  ;;  %vm653_vm5 = vcmask 46080  }
  0x20   : > { %s1017_s23 = sshll.u32 %s1353_s10, 4  ;;  %v763_v28 = vld [vmem:[%s1347_s6] sm:$0xff]  ;;  %v764_v29 = vld [vmem:[%s1347_s6 + $0x8] sm:$0xff]  ;;  %s1000_s27 = sshll.u32 %s1353_s10, 3  ;;  %vm846_vm6 = vcmask 64512   ;;  %vm676_vm7 = vcmask 1040384  }
  0x21   : > { %1124 = vmatprep.subr.bf16.mxu1 %v1123_v3  ;;  %s368_s26 = scalar_lea.vmem %s1342_s1, %s1017_s23  ;;  %s373_s29 = scalar_lea.vmem %s1343_s2, %s1017_s23  ;;  %v1135_v30 = vpack.c.bf16 %v764_v29, %v763_v28 }
  0x22   : > { %1126 = vmatpush3.bf16.msra.mxu1 %v1123_v3  ;;  %v386_v4 = vld [vmem:[%s368_s26] sm:$0xff]  ;;  %v387_v5 = vld [vmem:[%s368_s26 + $0x8] sm:$0xff]  ;;  %s390_s26 = sld [smem:[#allocation2]]  ;;  %s385_s11 = scalar_lea.vmem %s1350_s9, %s1000_s27 }
  0x23   : > { %v388_v6 = vld [vmem:[%s373_s29] sm:$0xff]  ;;  %v1103_v7 = vpack.c.bf16 %v387_v5, %v386_v4  ;;  %v389_v8 = vld [vmem:[%s373_s29 + $0x8] sm:$0xff]  ;;  %v392_v9 = vmul.f32 %v386_v4, %v386_v4  ;;  %v393_v10 = vmul.f32 %v387_v5, %v387_v5  ;;  %s381_s14 = scalar_lea.vmem %s1349_s8, %s1000_s27  ;;  %s999_s15 = sshll.u32 %s1353_s10, 1 }
  0x24   : > { %v1107_v11 = vpack.c.bf16 %v389_v8, %v388_v6  ;;  %v394_v13 = vmul.f32 %v388_v6, %v388_v6  ;;  %v395_v14 = vmul.f32 %v389_v8, %v389_v8  ;;  %v396_v16 = vmul.f32 %v388_v6, %v386_v4  ;;  %s377_s19 = scalar_lea.vmem %s1348_s7, %s999_s15 }
  0x25   : > { %1104 = vmatprep.subr.bf16.mxu0 %v1103_v7  ;;  %1128 = vmatprep.subr.bf16.mxu1 %v1103_v7  ;;  %v1111_v12 = vpack.c.bf16 %v393_v10, %v392_v9  ;;  %v397_v17 = vmul.f32 %v389_v8, %v387_v5  ;;  %v623_v57 = vstv %s1002_s25 }
  0x26   : > { %1106 = vmatpush3.bf16.msra.mxu0 %v1103_v7  ;;  %v1115_v15 = vpack.c.bf16 %v395_v14, %v394_v13 }
  0x27   : > { %1108 = vmatprep.subr.bf16.mxu0 %v1107_v11  ;;  %v1119_v18 = vpack.c.bf16 %v397_v17, %v396_v16 }
  0x28   : > { %v642_v60 = vstv %s390_s26 }
  0x2a   : > { %1110 = vmatpush3.bf16.msra.mxu0 %v1107_v11 }
  0x2b   : > { %1112 = vmatprep.subr.bf16.mxu0 %v1111_v12 }
  0x2e   : > { %1114 = vmatpush3.bf16.msra.mxu0 %v1111_v12 }
  0x2f   : > { %1116 = vmatprep.subr.bf16.mxu0 %v1115_v15 }
  0x32   : > { %1118 = vmatpush3.bf16.msra.mxu0 %v1115_v15 }
  0x33   : > { %1120 = vmatprep.subr.bf16.mxu0 %v1119_v18 }
  0x36   : > { %1122 = vmatpush3.bf16.msra.mxu0 %v1119_v18 }
  0x39   : > { %1070 = vmatmul.mubr.msk.f32.vlgmr.msra.gmra.mrb[0].mxu0 %vm402_vm0, %v399_v19 }
  0x3a   : > { %1072 = vmatprep.mubr.msk.f32.mxu0 %vm402_vm0, %v400_v20 }
  0x3d   : > { %1073 = vmatmul.mubr.msk.f32.gmra.mrb[2].mxu0 %vm402_vm0, %v401_v21 }
 0x10c   : > { %v1071_v22 = vpop.f32.mrb[0].mxu0 }
 0x10d   : > { %v481_v23 = vpop.f32.mrb[1].mxu0 }
 0x10e   : > { %1079 = vmatprep.mubr.msk.f32.mxu1 %vm502_vm1, %v481_v23 }
 0x10f   : > { %1080 = vmatmul.mubr.msk.f32.vlgmr.msra.gmra.mrb[0].mxu1 %vm502_vm1, %v1071_v22 }
 0x110   : > { %v1074_v24 = vpop.f32.mrb[2].mxu0  ;;  %1130 = vmatpush3.bf16.msra.mxu1 %v1103_v7 }
 0x111   : > { %v491_v25 = vpop.f32.mrb[3].mxu0  ;;  %1132 = vmatprep.subr.bf16.mxu1 %v1107_v11 }
 0x112   : > { %1082 = vmatprep.mubr.msk.f32.mxu1 %vm502_vm1, %v491_v25 }
 0x113   : > { %1083 = vmatmul.mubr.msk.f32.gmra.mrb[2].mxu1 %vm502_vm1, %v1074_v24 }
 0x114   : > { %1134 = vmatpush3.bf16.msra.mxu1 %v1107_v11  ;;  %1093 = vmatprep.mubr.msk.f32.mxu1 %vm681_vm2, %v679_v26 }
 0x115   : > { %1136 = vmatprep.subr.bf16.mxu1 %v1135_v30 }
 0x117   : > { %1094 = vmatmul.mubr.msk.f32.vlgmr.msra.gmra.mrb[4].mxu1 %vm681_vm2, %v680_v27 }
 0x118   : > { %1138 = vmatpush3.bf16.msra.mxu1 %v1135_v30 }
 0x1e2   : > { %v1081_v31 = vpop.f32.mrb[0].mxu1 }
 0x1e3   : > { %v601_v32 = vmul.f32 %v1081_v31, %v1081_v31  ;;  %v606_v33 = vrot.slane %v1081_v31, 6  ;;  %v581_v34 = vpop.f32.mrb[1].mxu1 }
 0x1e4   : > { %v600_v35 = vmul.f32 %v581_v34, %v581_v34  ;;  %v605_v36 = vrot.slane %v581_v34, 6 }
 0x1e5   : > { %v617_v37 = vrot.slane %v601_v32, 4  ;;  %v646_v38 = vrot.slane %v601_v32, 6 }
 0x1e6   : > { %v645_v39 = vrot.slane %v600_v35, 6  ;;  %v1084_v40 = vpop.f32.mrb[2].mxu1  ;;  %v607_v41 = vsel %vm604_vm3, %v605_v36, %v606_v33  ;;  %v611_v42 = vrot.slane %v600_v35, 4 }
 0x1e7   : > { %v609_v43 = vmul.f32 %v607_v41, %v581_v34  ;;  %v591_v44 = vpop.f32.mrb[3].mxu1 }
 0x1e8   : > { %v647_v45 = vsel %vm604_vm3, %v645_v39, %v646_v38  ;;  %v613_v46 = vsub.f32 %v1081_v31, %v611_v42  ;;  %v614_v47 = vsub.f32 %v591_v44, %v611_v42  ;;  %v618_v48 = vsel %vm616_vm4, %v611_v42, %v617_v37 }
 0x1e9   : > { %v621_v49 = vsub.f32 %v1084_v40, %v609_v43  ;;  %v649_v50 = vadd.f32 %v647_v45, %v600_v35  ;;  %v620_v51 = vsub.f32 %v591_v44, %v618_v48  ;;  %v641_v1 = vmul.f32 2.0, %v609_v43 }
 0x1ea   : > { %v1095_v52 = vpop.f32.mrb[4].mxu1 }
 0x1eb   : > { %v626_v53 = vrot.slane %v620_v51, 6  ;;  %v754_v54 = vpop.f32.mrb[5].mxu1  ;;  %v650_v61 = vadd.f32 %v649_v50, %v642_v60  ;;  %v622_v62 = vmul.f32 2.0, %v621_v49  ;;  %v643_v7 = vadd.f32 %v642_v60, %v641_v1 }
 0x1ec   : > { %1100 = vmatprep.mubr.msk.f32.mxu1 %vm502_vm1, %v754_v54 }
 0x1ed   : > { %v628_v55 = vadd.f32 %v626_v53, %v613_v46  ;;  %v629_v56 = vadd.f32 %v626_v53, %v614_v47  ;;  %1101 = vmatmul.mubr.msk.f32.vlgmr.msra.gmra.mrb[6].mxu1 %vm502_vm1, %v1095_v52  ;;  %v624_v4 = vadd.f32 %v623_v57, %v622_v62 }
 0x1ef   : > { %v630_v58 = vadd.f32 %v628_v55, %v623_v57  ;;  %v631_v59 = vadd.f32 %v629_v56, %v623_v57 }
 0x1f1   : > { %1162 = vrcp.f32 %v630_v58 }
 0x1f2   : > { %1164 = vrcp.f32 %v631_v59 }
 0x1f3   : > { %1166 = vrcp.f32 %v650_v61 }
 0x1fb   : > { %v1163_v63 = vpop.eup %1162 }
 0x1fc   : > { %v1165_v0 = vpop.eup %1164  ;;  %v636_v2 = vrot.slane %v1163_v63, 4 }
 0x1fd   : > { %v637_v3 = vrot.slane %v1165_v0, 4  ;;  %v1167_v9 = vpop.eup %1166 }
 0x1ff   : > { %v638_v5 = vsel %vm616_vm4, %v636_v2, %v637_v3 }
 0x200   : > { %v640_v6 = vmul.f32 %v638_v5, %v624_v4 }
 0x202   : > { %v644_v8 = vmul.f32 %v643_v7, %v640_v6  ;;  %v664_v12 = vsel %vm653_vm5, %v640_v6, 0.0 }
 0x204   : > { %v652_v10 = vmul.f32 %v1167_v9, %v644_v8 }
 0x206   : > { %v654_v11 = vsel %vm653_vm5, %v652_v10, 0.0 }
 0x207   : > { %655 = vadd.xlane.f32.xlu0 %v654_v11 }
 0x20b   : > { %665 = vadd.xlane.f32.xlu0 %v664_v12 }
 0x294   : > { %v656_v13 = vpop.xlane.xlu0 %655 }
 0x295   : > { %v657_v14 = vrot.slane %v656_v13, 4 }
 0x297   : > { %v658_v15 = vadd.f32 %v657_v14, %v656_v13 }
 0x298   : > { %v666_v16 = vpop.xlane.xlu0 %665 }
 0x299   : > { %v659_v17 = vrot.slane %v658_v15, 2  ;;  %v667_v18 = vrot.slane %v666_v16, 4 }
 0x29b   : > { %v668_v19 = vadd.f32 %v667_v18, %v666_v16  ;;  %v660_v20 = vadd.f32 %v659_v17, %v658_v15 }
 0x29d   : > { %v669_v21 = vrot.slane %v668_v19, 2  ;;  %v661_v22 = vrot.slane %v660_v20, 1 }
 0x29f   : > { %v670_v23 = vadd.f32 %v669_v21, %v668_v19  ;;  %v662_v24 = vadd.f32 %v661_v22, %v660_v20 }
 0x2a1   : > { %1139 = vpush %v662_v24  ;;  %v671_v25 = vrot.slane %v670_v23, 1 }
 0x2a3   : > { %v672_v26 = vadd.f32 %v671_v25, %v670_v23 }
 0x2a5   : > { %1141 = vpush %v672_v26 }
 0x2c0   : > { %v1102_v27 = vpop.f32.mrb[6].mxu1 }
 0x2c1   : > { %848 = vst.msk [vmem:[%s385_s11] sm:$0xff] %vm846_vm6, %v1102_v27  ;;  %v837_v28 = vpop.f32.mrb[7].mxu1 }
 0x2c2   : > { %847 = vst.msk [vmem:[%s381_s14] sm:$0xff] %vm846_vm6, %v837_v28 }
 0x2d2   : > { %s1140_s16 = spop %1139 }
 0x2d3   : > { %v674_v29 = vstv %s1140_s16 }
 0x2d6   : > { %s1142_s20 = spop %1141 }
 0x2d7   : > { %v675_v30 = vstv %s1142_s20 }
 0x2d8   : > { %v677_v31 = vsel %vm676_vm7, %v674_v29, %v675_v30 }
 0x2d9   : > { %678 = vst [vmem:[%s377_s19] sm:$0x3] %v677_v31 }
 0x2da PF: > { %s21_s30 = sadd.s32 1, %s1193_s30  }
 0x2db   : > { %p18_p1 = scmp.ge.s32.totalorder %s21_s30, 8  }
 0x2dd   :  { %20 = sbr.rel (!%p18_p1) target bundleno = 1 (0x1), region = 110 }
 0x2e4   :  { %896 = vsyncpa [#allocation3], 1 }
 0x2e5   :  { %898 = vsyncpa [#allocation3 + $0x1], 1 }

// kernel: msssim.8
= control target key start
LH: loop header
LB: loop body
LE: loop exit
PB: predicated region body
PF: predicated region fallthrough
CT: control target
= control target key end

     0   :  { %15 = vsyncpa [#allocation3], 0  ;;  %s1068_s30 = smov 0   ;;  %s1143_s0 = inlined_call_operand.vmem [shape: f32[2], index: 0, kind: input, shape index: {}]   ;;  %s1144_s1 = inlined_call_operand.vmem [shape: f32[6,4,4], index: 1, kind: input, shape index: {}]   ;;  %s1145_s2 = inlined_call_operand.vmem [shape: f32[6,4,4], index: 2, kind: input, shape index: {}]   ;;  %s1146_s3 = inlined_call_operand.vmem [shape: f32[5,20], index: 3, kind: input, shape index: {}]   ;;  %s1147_s4 = inlined_call_operand.vmem [shape: f32[4,1], index: 4, kind: input, shape index: {}]   ;;  %s1148_s5 = inlined_call_operand.vmem [shape: f32[4,8], index: 5, kind: input, shape index: {}]   ;;  %s1149_s6 = inlined_call_operand.vmem [shape: f32[4,2], index: 6, kind: input, shape index: {}]   ;;  %s1150_s7 = inlined_call_operand.vmem [shape: f32[6,2,128], index: 7, kind: output, shape index: {0}]   ;;  %s1151_s8 = inlined_call_operand.vmem [shape: f32[6,2,2], index: 8, kind: output, shape index: {1}]   ;;  %s1152_s9 = inlined_call_operand.vmem [shape: f32[6,2,2], index: 9, kind: output, shape index: {2}]  }
   0x1 LB: > { %s1074_s10 = sadd.s32 4294967295, %s1012_s30   ;;  %p900_p0 = scmp.ge.s32.totalorder %s1012_s30, 1  ;;  %s1012_s30 = sphi %s1068_s30, %s21_s30  }
   0x2   : > { %p261_p1 = scmp.lt.s32.totalorder %s1012_s30, 7  ;;  %s274_s13 = sshll.u32 %s1143_s0, 4  ;;  %s275_s13 = int_to_ptr.vmem [resolvable:$true] %s274_s13 }
   0x3   : > { %p969_p3 = scmp.eq.s32.totalorder %s1074_s10, 0  ;;  %s987_s15 = scalar_lea.vmem %s275_s13, 16 }
   0x4   : > { %p1081_p2 = pnand %p900_p0, %p261_p1  ;;  %p988_p6 = scmp.ne.s32.totalorder %s275_s13, %s987_s15 }
   0x5   : > { %p995_p10 = scmp.lt.s32.totalorder %s275_s13, %s275_s13  ;;  %p996_p11 = scmp.lt.s32.totalorder %s987_s15, %s987_s15 }
   0x6   : > { %p965_p4 = pneg %p1081_p2 }
   0x7   : > { %p997_p12 = por %p996_p11, %p995_p10 }
   0x8   : > { %p966_p5 = pnand %p969_p3, %p965_p4 }
   0xa   : > { %p989_p7 = pneg %p966_p5 }
   0xc   : > { %p990_p8 = pnand %p989_p7, %p988_p6 }
   0xe   : > { %p991_p9 = pneg %p990_p8 }
  0x10   : > { %p998_p13 = pnand %p997_p12, %p991_p9 }
  0x12   : > { %1001 = shalt.err (!%p998_p13)
}
  0x13   : > { %s1014_s16 = smov [#allocation2]   ;;  %313 = sbr.rel (%p1081_p2) target bundleno = 690 (0x2b2), region = 48 }
  0x14   : > { %968 = dma.vmem_to_smem (!%p966_p5), %s275_s13, 16, %s1014_s16, [#allocation3]  }
  0x1a   : > { %1007 = dma.done.wait (%p969_p3), [#allocation3], 16  }
  0x1b   : > { %1009 = vsyncadd (%p969_p3), [#allocation3], 4294967280 }
  0x1c   : > { %319 = sfence }
  0x1d   : > { %p360_p0 = scmp.lt.s32.totalorder %s1074_s10, 5  ;;  %v1015_v0 = vmov 0.0|0.0   ;;  %vm1016_vm0 = vmmov 0   ;;  %v1017_v1 = vmov 0.0   ;;  %v474_v2 = vld [vmem:[%s1147_s4] sm:$0xf] }
  0x1e   : > { %954 = vmatprep.subr.bf16.mxu0 %v1015_v0  ;;  %936 = vmatprep.mubr.msk.f32.mxu0 %vm1016_vm0, %v1017_v1  ;;  %vm393_vm1 = vcmask 1043456   ;;  %v396_v13 = vld [vmem:[%s1146_s3] sm:$0x1f]  ;;  %vm397_vm2 = vcmask 162816   ;;  %vm475_vm3 = vcmask 31744   ;;  %vm604_vm4 = vcmask 64512  }
  0x1f   : > { %s1155_s10 = smov (!%p360_p0, %s1074_s10), 5  ;;  %939 = vmatprep.subr.mxu1 %v1017_v1  ;;  %941 = vmatprep.mubr.msk.f32.mxu1 %vm1016_vm0, %v1017_v1  ;;  %v603_v16 = vld [vmem:[%s1148_s5] sm:$0xf]  ;;  %s910_s13 = sld [smem:[#allocation2 + $0x1]]  ;;  %vm600_vm5 = vcmask 1040384   ;;  %vm755_vm6 = vcmask 9216  }
  0x20   : > { %940 = vmatpush3.msk.msra.mxu1 %vm393_vm1, %v474_v2  ;;  %s905_s19 = sshll.u32 %s1155_s10, 2  ;;  %v678_v17 = vld [vmem:[%s1149_s6] sm:$0xf]  ;;  %s382_s14 = sld [smem:[#allocation2]]  ;;  %vm757_vm7 = vcmask 11266  }
  0x21   : > { %944 = vmatprep.subr.mxu1 %v1017_v1  ;;  %s363_s22 = scalar_lea.vmem %s1144_s1, %s905_s19  ;;  %s367_s25 = scalar_lea.vmem %s1145_s2, %s905_s19 }
  0x22   : > { %v380_v3 = vld [vmem:[%s363_s22] sm:$0xf]  ;;  %s907_s15 = sshll.u32 %s1155_s10, 1 }
  0x23   : > { %v381_v4 = vld [vmem:[%s367_s25] sm:$0xf]  ;;  %v384_v5 = vmul.f32 %v380_v3, %v380_v3  ;;  %s371_s19 = scalar_lea.vmem %s1150_s7, %s907_s15  ;;  %s375_s23 = scalar_lea.vmem %s1151_s8, %s907_s15 }
  0x24   : > { %v385_v6 = vmul.f32 %v381_v4, %v381_v4  ;;  %v388_v7 = vrot.slane %v381_v4, 4  ;;  %v386_v12 = vmul.f32 %v381_v4, %v380_v3  ;;  %s379_s26 = scalar_lea.vmem %s1152_s9, %s907_s15 }
  0x25   : > { %v566_v28 = vstv %s910_s13 }
  0x26   : > { %v391_v8 = vrot.slane %v385_v6, 4  ;;  %v394_v9 = vsel %vm393_vm1, %v380_v3, %v388_v7  ;;  %v579_v34 = vstv %s382_s14 }
  0x28   : > { %v395_v10 = vsel %vm393_vm1, %v384_v5, %v391_v8 }
  0x29   : > { %v955_v11 = vpack.c.bf16 %v395_v10, %v394_v9 }
  0x2b   : > { %956 = vmatpush3.bf16.msra.mxu0 %v955_v11 }
  0x2c   : > { %934 = vmatprep.subr.mxu0 %v1017_v1 }
  0x2f   : > { %935 = vmatpush3.msk.msra.mxu0 %vm393_vm1, %v386_v12 }
  0x30   : > { %937 = vmatmul.mubr.msk.f32.vlgmr.msra.gmra.mrb[0].mxu0 %vm397_vm2, %v396_v13  ;;  %949 = vmatprep.subr.mxu0 %v1017_v1 }
  0x31   : > { %951 = vmatprep.mubr.msk.f32.mxu0 %vm1016_vm0, %v1017_v1  ;;  %950 = vmatpush3.msk.msra.mxu0 %vm393_vm1, %v678_v17 }
 0x103   : > { %v470_v14 = vpop.f32.mrb[0].mxu0 }
 0x104   : > { %v938_v15 = vpop.f32.mrb[1].mxu0  ;;  %942 = vmatmul.mubr.msk.f32.vlgmr.msra.gmra.mrb[0].mxu1 %vm475_vm3, %v470_v14 }
 0x105   : > { %945 = vmatpush3.msra.mxu1 %v394_v9  ;;  %946 = vmatprep.mubr.msk.f32.mxu1 %vm1016_vm0, %v1017_v1 }
 0x108   : > { %947 = vmatmul.mubr.msk.f32.vlgmr.msra.gmra.mrb[2].mxu1 %vm604_vm4, %v603_v16 }
 0x1d7   : > { %v548_v18 = vpop.f32.mrb[0].mxu1 }
 0x1d8   : > { %v552_v19 = vmul.f32 %v548_v18, %v548_v18  ;;  %v943_v20 = vpop.f32.mrb[1].mxu1  ;;  %v554_v22 = vrot.slane %v548_v18, 1 }
 0x1da   : > { %v558_v21 = vrot.slane %v552_v19, 6  ;;  %v556_v27 = vmul.f32 %v554_v22, %v548_v18  ;;  %v585_v30 = vrot.slane %v552_v19, 1 }
 0x1db   : > { %v674_v23 = vpop.f32.mrb[2].mxu1 }
 0x1dc   : > { %v560_v24 = vsub.f32 %v548_v18, %v558_v21  ;;  %v948_v25 = vpop.f32.mrb[3].mxu1  ;;  %952 = vmatmul.mubr.msk.f32.vlgmr.msra.gmra.mrb[2].mxu0 %vm475_vm3, %v674_v23  ;;  %v562_v32 = vrot.slane %v556_v27, 4  ;;  %v587_v33 = vadd.f32 %v585_v30, %v552_v19  ;;  %v578_v41 = vmul.f32 2.0, %v556_v27 }
 0x1de   : > { %v569_v26 = vrot.slane %v560_v24, 1  ;;  %v564_v35 = vsub.f32 %v548_v18, %v562_v32  ;;  %v588_v36 = vadd.f32 %v587_v33, %v579_v34  ;;  %v580_v43 = vadd.f32 %v579_v34, %v578_v41 }
 0x1e0   : > { %v571_v29 = vadd.f32 %v569_v26, %v560_v24  ;;  %v565_v37 = vmul.f32 2.0, %v564_v35 }
 0x1e2   : > { %v572_v31 = vadd.f32 %v571_v29, %v566_v28  ;;  %v567_v39 = vadd.f32 %v566_v28, %v565_v37 }
 0x1e4   : > { %983 = vrcp.f32 %v572_v31 }
 0x1e5   : > { %985 = vrcp.f32 %v588_v36 }
 0x1ee   : > { %v984_v38 = vpop.eup %983 }
 0x1ef   : > { %v575_v40 = vrot.slane %v984_v38, 6  ;;  %v986_v46 = vpop.eup %985 }
 0x1f1   : > { %v577_v42 = vmul.f32 %v575_v40, %v567_v39 }
 0x1f3   : > { %v582_v44 = vrot.slane %v577_v42, 4 }
 0x1f5   : > { %v584_v45 = vmul.f32 %v582_v44, %v580_v43 }
 0x1f7   : > { %v590_v47 = vmul.f32 %v986_v46, %v584_v45 }
 0x1f9   : > { %957 = vpush %v590_v47 }
 0x1fa   : > { %959 = vpush %v582_v44 }
 0x22a   : > { %s958_s16 = spop %957 }
 0x22b   : > { %v598_v48 = vstv %s958_s16  ;;  %s960_s20 = spop %959 }
 0x22c   : > { %v599_v49 = vstv %s960_s20 }
 0x22d   : > { %v601_v50 = vsel %vm600_vm5, %v598_v48, %v599_v49 }
 0x22e   : > { %602 = vst [vmem:[%s371_s19] sm:$0x3] %v601_v50 }
 0x2af   : > { %v751_v51 = vpop.f32.mrb[2].mxu0 }
 0x2b0   : > { %756 = vst.msk [vmem:[%s375_s23] sm:$0x3] %vm755_vm6, %v751_v51  ;;  %v953_v52 = vpop.f32.mrb[3].mxu0 }
 0x2b1   : > { %758 = vst.msk [vmem:[%s379_s26 - $0x2] sm:$0xc] %vm757_vm7, %v751_v51 }
 0x2b2 PF: > { %s21_s30 = sadd.s32 1, %s1012_s30  }
 0x2b3   : > { %p18_p1 = scmp.ge.s32.totalorder %s21_s30, 8  }
 0x2b5   :  { %20 = sbr.rel (!%p18_p1) target bundleno = 1 (0x1), region = 110 }
 0x2bc   :  { %806 = vsyncpa [#allocation3], 1 }
 0x2bd   :  { %808 = vsyncpa [#allocation3 + $0x1], 1 }

// kernel: msssim.9
= control target key start
LH: loop header
LB: loop body
LE: loop exit
PB: predicated region body
PF: predicated region fallthrough
CT: control target
= control target key end

     0   :  { %10 = vsyncpa [#allocation3], 0  ;;  %s688_s18 = smov 0   ;;  %s736_s0 = inlined_call_operand.vmem [shape: f32[2], index: 0, kind: input, shape index: {}]   ;;  %s737_s1 = inlined_call_operand.vmem [shape: f32[6,2,2], index: 1, kind: input, shape index: {}]   ;;  %s738_s2 = inlined_call_operand.vmem [shape: f32[6,2,2], index: 2, kind: input, shape index: {}]   ;;  %s739_s3 = inlined_call_operand.vmem [shape: f32[5,10], index: 3, kind: input, shape index: {}]   ;;  %s740_s4 = inlined_call_operand.vmem [shape: f32[2,1], index: 4, kind: input, shape index: {}]   ;;  %s741_s5 = inlined_call_operand.vmem [shape: f32[6,2,128], index: 5, kind: output, shape index: {}]  }
   0x1 LB: > { %s557_s19 = sadd.s32 4294967295, %s651_s18   ;;  %p559_p0 = scmp.ge.s32.totalorder %s651_s18, 1  ;;  %s651_s18 = sphi %s688_s18, %s16_s18  }
   0x2   : > { %p162_p1 = scmp.lt.s32.totalorder %s651_s18, 7  ;;  %s175_s22 = sshll.u32 %s736_s0, 4  ;;  %s176_s22 = int_to_ptr.vmem [resolvable:$true] %s175_s22 }
   0x3   : > { %p607_p3 = scmp.eq.s32.totalorder %s557_s19, 0  ;;  %s626_s24 = scalar_lea.vmem %s176_s22, 16 }
   0x4   : > { %p699_p2 = pnand %p559_p0, %p162_p1  ;;  %p627_p6 = scmp.ne.s32.totalorder %s176_s22, %s626_s24 }
   0x5   : > { %p634_p10 = scmp.lt.s32.totalorder %s176_s22, %s176_s22  ;;  %p635_p11 = scmp.lt.s32.totalorder %s626_s24, %s626_s24 }
   0x6   : > { %p603_p4 = pneg %p699_p2 }
   0x7   : > { %p636_p12 = por %p635_p11, %p634_p10 }
   0x8   : > { %p604_p5 = pnand %p607_p3, %p603_p4 }
   0xa   : > { %p628_p7 = pneg %p604_p5 }
   0xc   : > { %p629_p8 = pnand %p628_p7, %p627_p6 }
   0xe   : > { %p630_p9 = pneg %p629_p8 }
  0x10   : > { %p637_p13 = pnand %p636_p12, %p630_p9 }
  0x12   : > { %640 = shalt.err (!%p637_p13)
}
  0x13   : > { %s653_s25 = smov [#allocation2]   ;;  %208 = sbr.rel (%p699_p2) target bundleno = 557 (0x22d), region = 40 }
  0x14   : > { %606 = dma.vmem_to_smem (!%p604_p5), %s176_s22, 16, %s653_s25, [#allocation3]  }
  0x1a   : > { %646 = dma.done.wait (%p607_p3), [#allocation3], 16  }
  0x1b   : > { %648 = vsyncadd (%p607_p3), [#allocation3], 4294967280 }
  0x1c   : > { %214 = sfence }
  0x1d   : > { %p239_p0 = scmp.lt.s32.totalorder %s557_s19, 5  ;;  %v654_v0 = vmov 0.0|0.0   ;;  %vm655_vm0 = vmmov 0   ;;  %v656_v1 = vmov 0.0   ;;  %vm267_vm1 = vcmask 1041408   ;;  %s567_s12 = sld [smem:[#allocation2 + $0x1]] }
  0x1e   : > { %591 = vmatprep.subr.bf16.mxu0 %v654_v0  ;;  %583 = vmatprep.mubr.msk.f32.mxu0 %vm655_vm0, %v656_v1  ;;  %vm269_vm2 = vcmask 1043456   ;;  %vm271_vm3 = vcmask 1045504   ;;  %vm657_vm4 = vmmov 1   ;;  %v273_v14 = vld [vmem:[%s739_s3] sm:$0x1f]  ;;  %vm274_vm6 = vcmask 80896  }
  0x1f   : > { %s744_s19 = smov (!%p239_p0, %s557_s19), 5  ;;  %586 = vmatprep.subr.mxu1 %v656_v1  ;;  %588 = vmatprep.mubr.msk.f32.mxu1 %vm655_vm0, %v656_v1  ;;  %vm593_vm5 = vmpackc.low %vm267_vm1, %vm657_vm4  ;;  %v351_v15 = vld [vmem:[%s740_s4] sm:$0x3]  ;;  %vm352_vm7 = vcmask 15360   ;;  %s253_s13 = sld [smem:[#allocation2]]  ;;  %vm477_vm8 = vcmask 1040384  }
  0x20   : > { %s710_s26 = sshll.u32 %s744_s19, 1  ;;  %587 = vmatpush3.msk.msra.mxu1 %vm267_vm1, %v351_v15 }
  0x21   : > { %s242_s29 = scalar_lea.vmem %s737_s1, %s710_s26  ;;  %s246_s7 = scalar_lea.vmem %s738_s2, %s710_s26 }
  0x22   : > { %v251_v2 = vld [vmem:[%s242_s29] sm:$0x3]  ;;  %s250_s17 = scalar_lea.vmem %s741_s5, %s710_s26 }
  0x23   : > { %v252_v3 = vld [vmem:[%s246_s7] sm:$0x3]  ;;  %v255_v4 = vmul.f32 %v251_v2, %v251_v2  ;;  %v443_v26 = vstv %s567_s12 }
  0x24   : > { %v256_v5 = vmul.f32 %v252_v3, %v252_v3  ;;  %v259_v6 = vrot.slane %v252_v3, 6  ;;  %v257_v7 = vmul.f32 %v252_v3, %v251_v2 }
  0x25   : > { %v262_v8 = vrot.slane %v255_v4, 4  ;;  %v456_v32 = vstv %s253_s13 }
  0x26   : > { %v265_v9 = vrot.slane %v256_v5, 2  ;;  %v268_v10 = vsel %vm267_vm1, %v251_v2, %v259_v6 }
  0x27   : > { %v270_v11 = vsel %vm269_vm2, %v268_v10, %v262_v8 }
  0x28   : > { %v272_v12 = vsel %vm271_vm3, %v270_v11, %v265_v9 }
  0x29   : > { %v592_v13 = vpack.c.bf16 %v257_v7, %v272_v12 }
  0x2b   : > { %594 = vmatpush3.bf16.msk.msra.mxu0 %vm593_vm5, %v592_v13 }
  0x2e   : > { %584 = vmatmul.mubr.msk.f32.vlgmr.msra.gmra.mrb[0].mxu0 %vm274_vm6, %v273_v14 }
 0x101   : > { %v347_v16 = vpop.f32.mrb[0].mxu0 }
 0x102   : > { %v585_v17 = vpop.f32.mrb[1].mxu0  ;;  %589 = vmatmul.mubr.msk.f32.vlgmr.msra.gmra.mrb[0].mxu1 %vm352_vm7, %v347_v16 }
 0x1d5   : > { %v425_v18 = vpop.f32.mrb[0].mxu1 }
 0x1d6   : > { %v429_v19 = vmul.f32 %v425_v18, %v425_v18  ;;  %v590_v20 = vpop.f32.mrb[1].mxu1  ;;  %v431_v22 = vrot.slane %v425_v18, 1 }
 0x1d8   : > { %v435_v21 = vrot.slane %v429_v19, 6  ;;  %v433_v25 = vmul.f32 %v431_v22, %v425_v18  ;;  %v462_v28 = vrot.slane %v429_v19, 1 }
 0x1da   : > { %v437_v23 = vsub.f32 %v425_v18, %v435_v21  ;;  %v439_v30 = vrot.slane %v433_v25, 4  ;;  %v464_v31 = vadd.f32 %v462_v28, %v429_v19  ;;  %v455_v39 = vmul.f32 2.0, %v433_v25 }
 0x1dc   : > { %v446_v24 = vrot.slane %v437_v23, 1  ;;  %v441_v33 = vsub.f32 %v425_v18, %v439_v30  ;;  %v465_v34 = vadd.f32 %v464_v31, %v456_v32  ;;  %v457_v41 = vadd.f32 %v456_v32, %v455_v39 }
 0x1de   : > { %v448_v27 = vadd.f32 %v446_v24, %v437_v23  ;;  %v442_v35 = vmul.f32 2.0, %v441_v33 }
 0x1e0   : > { %v449_v29 = vadd.f32 %v448_v27, %v443_v26  ;;  %v444_v37 = vadd.f32 %v443_v26, %v442_v35 }
 0x1e2   : > { %622 = vrcp.f32 %v449_v29 }
 0x1e3   : > { %624 = vrcp.f32 %v465_v34 }
 0x1ec   : > { %v623_v36 = vpop.eup %622 }
 0x1ed   : > { %v452_v38 = vrot.slane %v623_v36, 6  ;;  %v625_v44 = vpop.eup %624 }
 0x1ef   : > { %v454_v40 = vmul.f32 %v452_v38, %v444_v37 }
 0x1f1   : > { %v459_v42 = vrot.slane %v454_v40, 4 }
 0x1f3   : > { %v461_v43 = vmul.f32 %v459_v42, %v457_v41 }
 0x1f5   : > { %v467_v45 = vmul.f32 %v625_v44, %v461_v43 }
 0x1f7   : > { %595 = vpush %v467_v45 }
 0x1f8   : > { %597 = vpush %v459_v42 }
 0x228   : > { %s596_s14 = spop %595 }
 0x229   : > { %v475_v46 = vstv %s596_s14  ;;  %s598_s19 = spop %597 }
 0x22a   : > { %v476_v47 = vstv %s598_s19 }
 0x22b   : > { %v478_v48 = vsel %vm477_vm8, %v475_v46, %v476_v47 }
 0x22c   : > { %479 = vst [vmem:[%s250_s17] sm:$0x3] %v478_v48 }
 0x22d PF: > { %s16_s18 = sadd.s32 1, %s651_s18  }
 0x22e   : > { %p13_p1 = scmp.ge.s32.totalorder %s16_s18, 8  }
 0x230   :  { %15 = sbr.rel (!%p13_p1) target bundleno = 1 (0x1), region = 78 }
 0x237   :  { %499 = vsyncpa [#allocation3], 1 }
 0x238   :  { %501 = vsyncpa [#allocation3 + $0x1], 1 }

</bundles_post_ra>
